<compile_context>
chip_gen: v7x
topology: tpu7x:2x2x1
jax: 0.10.0
libtpu: 0.0.40
codegen_flags: <defaults>
</compile_context>

<pallas_src>
import functools

import jax
import jax.numpy as jnp
from jax.experimental import pallas as pl
from jax.experimental.pallas import tpu as pltpu  # noqa: F401  (no scratch/DMA needed; whole model is VMEM-resident by default)

# bf16 recurrent matmul = single MXU pass on v5e/v6e/v7x (f32xf32 is ~3x bf16
# passes).  Set to jnp.float32 if 1e-3 parity with an f32 reference is required.
RECURRENT_MM_DTYPE = jnp.bfloat16


# ----------------------------------------------------------------------------
# Fused kernel: 2 x BiLSTM + head, everything resident in VMEM, no grid.
#
# Combined gate layout (8H lanes, gate-major / direction-minor):
#     [ i_f i_b | f_f f_b | g_f g_b | o_f o_b ]        (each block is H lanes)
# State layout (2H lanes):  h = [h_fwd | h_bwd],  c = [c_fwd | c_bwd]
# W_hh_comb is block diagonal (rows 0:H -> fwd columns, rows H:2H -> bwd
# columns), so one 256-wide matmul advances both directions at once.
# The i/f/o columns of all weights & bias carry a folded 0.5 so that
#     sigmoid(z) = 0.5 * tanh(z/2) + 0.5
# becomes one tanh over the whole gate vector + one affine.
# ----------------------------------------------------------------------------
def _fused_kernel(xf_ref, xr_ref,
                  wf1_ref, wb1_ref, b1_ref, whh1_ref,
                  wf2_ref, wb2_ref, b2_ref, whh2_ref,
                  hw1_ref, hb1_ref, hw2_ref, hb2_ref, hw_ref, hb_ref,
                  out_ref, *, T, B, H):
    f32 = jnp.float32
    H2, H4, H6, H8 = 2 * H, 4 * H, 6 * H, 8 * H

    # Loop-invariant lane constants (hoisted: built once, shared by both layers).
    lane8 = jax.lax.broadcasted_iota(jnp.int32, (B, H8), 1)
    is_g = (lane8 >= H4) & (lane8 < H6)            # g-gate lanes keep pure tanh
    post_scale = jnp.where(is_g, 1.0, 0.5).astype(f32)
    post_bias = jnp.where(is_g, 0.0, 0.5).astype(f32)
    lane2 = jax.lax.broadcasted_iota(jnp.int32, (B, H2), 1)
    fwd_half = lane2 < H                           # [h_fwd | h_bwd] lane split

    def bilstm_layer(x_fwd, x_rev, wf_ref, wb_ref, b_ref, whh_ref):
        # (1) Hoisted input projection, off the serial critical path.
        #     x_rev is the time-reversed sequence, so gx row block s already
        #     holds fwd-gate input for time s AND bwd-gate input for time T-1-s
        #     (the "wrong-direction" columns of each W_ih are zero); bias
        #     (b_ih + b_hh, both directions, 0.5-folded) is added here too.
        gx = (jnp.dot(x_fwd, wf_ref[...], preferred_element_type=f32)
              + jnp.dot(x_rev, wb_ref[...], preferred_element_type=f32)
              + b_ref[...])

        whh = whh_ref[...]                         # (2H, 8H), bf16, loop-resident

        # (2) Recurrence: fully unrolled (T static), no VMEM traffic per step.
        h = jnp.zeros((B, H2), f32)                # [h_fwd | h_bwd]
        c = jnp.zeros((B, H2), f32)
        hs = []
        for s in range(T):
            # dot(...) + gx: single bf16 MXU pass, f32 accumulate; written so
            # Mosaic can fold the add onto the MXU result path (v7x MRB).
            gates = (jnp.dot(h.astype(whh.dtype), whh,
                             preferred_element_type=f32)
                     + gx[s * B:(s + 1) * B, :])
            # One tanh over the full 256-lane gate vector + one affine:
            # i/f/o lanes arrive pre-scaled by 0.5 -> 0.5*tanh + 0.5 == sigmoid.
            act = jnp.tanh(gates) * post_scale + post_bias
            i, f = act[:, 0:H2], act[:, H2:H4]
            g, o = act[:, H4:H6], act[:, H6:H8]
            c = f * c + i * g
            h = o * jnp.tanh(c)
            hs.append(h)                           # stays in vregs (1 vreg each)

        # (3) Post-loop sequence assembly (PyTorch bidirectional convention):
        #     out[t] = [ h_fwd(step t) | h_bwd(step T-1-t) ]  -> one lane select.
        parts = [jnp.where(fwd_half, hs[t], hs[T - 1 - t]) for t in range(T)]
        seq = jnp.concatenate(parts, axis=0)               # (T*B, 2H)
        seq_rev = jnp.concatenate(parts[::-1], axis=0)     # time-reversed copy
        return seq, seq_rev

    h1, h1r = bilstm_layer(xf_ref[...], xr_ref[...],
                           wf1_ref, wb1_ref, b1_ref, whh1_ref)
    h2, _ = bilstm_layer(h1, h1r, wf2_ref, wb2_ref, b2_ref, whh2_ref)

    # Head: relu(h1 w1 + b1) + relu(h2 w2 + b2) + h1 + h2 -> linear.
    # Final weight/bias are lane-padded to 128 so the only HBM-visible store is
    # unmasked lane-dense; the wrapper slices back to n_classes.
    l1 = jnp.maximum(
        jnp.dot(h1, hw1_ref[...], preferred_element_type=f32) + hb1_ref[...], 0.0)
    l2 = jnp.maximum(
        jnp.dot(h2, hw2_ref[...], preferred_element_type=f32) + hb2_ref[...], 0.0)
    hidden = h1 + h2 + l1 + l2
    out_ref[...] = (jnp.dot(hidden, hw_ref[...], preferred_element_type=f32)
                    + hb_ref[...])


# ----------------------------------------------------------------------------
# One-time weight preprocessing (run ONCE at model-load time, outside the
# per-call jitted path).
# ----------------------------------------------------------------------------
def _place_dir(w4, hidden, direction):
    """Scatter a (R, 4H) [i f g o] weight/bias into a (R, 8H) matrix whose
    columns are gate-major / direction-minor: [i_f i_b f_f f_b g_f g_b o_f o_b].
    Columns of the other direction are zero."""
    R = w4.shape[0]
    wg = w4.reshape(R, 4, 1, hidden)
    z = jnp.zeros_like(wg)
    parts = (wg, z) if direction == 0 else (z, wg)
    return jnp.concatenate(parts, axis=2).reshape(R, 8 * hidden)


def _fold_sigmoid_half(mat8, hidden):
    """Scale i/f/o gate columns by 0.5 (exact) so sigmoid(z)=0.5*tanh(z/2)+0.5
    needs only one in-kernel tanh + affine. g columns ([4H,6H)) untouched."""
    col = jnp.arange(8 * hidden)
    scale = jnp.where((col >= 4 * hidden) & (col < 6 * hidden), 1.0, 0.5)
    return mat8 * scale.astype(mat8.dtype)


def _prep_bilstm(p, hidden):
    wf = _fold_sigmoid_half(_place_dir(p["w_ih_f"], hidden, 0), hidden)
    wb = _fold_sigmoid_half(_place_dir(p["w_ih_b"], hidden, 1), hidden)
    bias = _fold_sigmoid_half(_place_dir(p["b_f"], hidden, 0)
                              + _place_dir(p["b_b"], hidden, 1), hidden)
    whh = jnp.concatenate([_place_dir(p["w_hh_f"], hidden, 0),
                           _place_dir(p["w_hh_b"], hidden, 1)], axis=0)
    whh = _fold_sigmoid_half(whh, hidden).astype(RECURRENT_MM_DTYPE)
    return wf, wb, bias, whh


def prepare_params(params, n_classes, nc_pad=128):
    """All trace-time weight massaging, amortized per-model (not per-call)."""
    H = params["lstm1"]["w_hh_f"].shape[0]
    F = 2 * H
    hp = params["head"]
    w_pad = jnp.zeros((F, nc_pad), jnp.float32).at[:, :n_classes].set(hp["w"])
    b_pad = jnp.zeros((1, nc_pad), jnp.float32).at[:, :n_classes].set(hp["b"])
    return {
        "lstm1": _prep_bilstm(params["lstm1"], H),
        "lstm2": _prep_bilstm(params["lstm2"], H),
        "head": (hp["w1"], hp["b1"], hp["w2"], hp["b2"], w_pad, b_pad),
    }


# ----------------------------------------------------------------------------
# Full model forward (single pallas_call, no grid, no scratch).
# ----------------------------------------------------------------------------
def hemo_lstm_basic(x, prepped, n_classes):
    B, T, E = x.shape
    H = prepped["lstm1"][3].shape[0] // 2          # whh is (2H, 8H); static shape
    NC_PAD = prepped["head"][4].shape[1]

    # Only per-call XLA glue left: one ~4 KB transpose/reverse of x.
    x_tm = jnp.transpose(x, (1, 0, 2))             # (T, B, E), time-major
    x_fwd = x_tm.reshape(T * B, E)
    x_rev = x_tm[::-1].reshape(T * B, E)           # time-reversed for bwd proj

    out_flat = pl.pallas_call(
        functools.partial(_fused_kernel, T=T, B=B, H=H),
        out_shape=jax.ShapeDtypeStruct((T * B, NC_PAD), jnp.float32),
        # No grid / BlockSpecs: the whole working set (~0.3 MiB) is VMEM-resident
        # as whole-array blocks; no double-buffering or vmem_limit needed on
        # v5e/v6e/v7x.
    )(x_fwd, x_rev, *prepped["lstm1"], *prepped["lstm2"], *prepped["head"])

    out = out_flat[:, :n_classes].reshape(T, B, n_classes)
    return jnp.transpose(out, (1, 0, 2))


# ----------------------------------------------------------------------------
# Deterministic parameter init (PyTorch-style uniform(-1/sqrt(fan), 1/sqrt(fan)))
# ----------------------------------------------------------------------------
def _uniform(key, shape, scale):
    return jax.random.uniform(key, shape, jnp.float32, -scale, scale)


def init_bilstm_params(key, in_dim, hidden):
    ks = jax.random.split(key, 12)
    s = 1.0 / jnp.sqrt(hidden)

    def one_dir(k):
        return {
            "w_ih": _uniform(k[0], (in_dim, 4 * hidden), s),
            "w_hh": _uniform(k[1], (hidden, 4 * hidden), s),
            "b": _uniform(k[2], (1, 4 * hidden), s)
                 + _uniform(k[3], (1, 4 * hidden), s),  # b_ih + b_hh
        }

    f = one_dir(ks[0:4])
    b = one_dir(ks[4:8])
    return {
        "w_ih_f": f["w_ih"], "w_hh_f": f["w_hh"], "b_f": f["b"],
        "w_ih_b": b["w_ih"], "w_hh_b": b["w_hh"], "b_b": b["b"],
    }


def init_params(key, embed_size, hidden, n_classes):
    k1, k2, k3, k4, k5 = jax.random.split(key, 5)
    F = 2 * hidden
    sF = 1.0 / jnp.sqrt(F)
    kl1a, kl1b = jax.random.split(k3)
    kl2a, kl2b = jax.random.split(k4)
    kla, klb = jax.random.split(k5)
    return {
        "lstm1": init_bilstm_params(k1, embed_size, hidden),
        "lstm2": init_bilstm_params(k2, F, hidden),
        "head": {
            "w1": _uniform(kl1a, (F, F), sF), "b1": _uniform(kl1b, (1, F), sF),
            "w2": _uniform(kl2a, (F, F), sF), "b2": _uniform(kl2b, (1, F), sF),
            "w": _uniform(kla, (F, n_classes), sF),
            "b": _uniform(klb, (1, n_classes), sF),
        },
    }


# ----------------------------------------------------------------------------
# Pure-JAX reference (exact f32 module semantics, for correctness sanity check)
# ----------------------------------------------------------------------------
def _lstm_dir_ref(x_tbd, w_ih, w_hh, b):
    T, B, _ = x_tbd.shape
    H = w_hh.shape[0]

    def step(carry, xt):
        h, c = carry
        gates = xt @ w_ih + h @ w_hh + b
        i = jax.nn.sigmoid(gates[:, 0 * H:1 * H])
        f = jax.nn.sigmoid(gates[:, 1 * H:2 * H])
        g = jnp.tanh(gates[:, 2 * H:3 * H])
        o = jax.nn.sigmoid(gates[:, 3 * H:4 * H])
        c = f * c + i * g
        h = o * jnp.tanh(c)
        return (h, c), h

    init = (jnp.zeros((B, H)), jnp.zeros((B, H)))
    _, hs = jax.lax.scan(step, init, x_tbd)
    return hs


def _bilstm_ref(x, p):
    x_tbd = jnp.transpose(x, (1, 0, 2))
    fwd = _lstm_dir_ref(x_tbd, p["w_ih_f"], p["w_hh_f"], p["b_f"])
    bwd = _lstm_dir_ref(x_tbd[::-1], p["w_ih_b"], p["w_hh_b"], p["b_b"])[::-1]
    return jnp.transpose(jnp.concatenate([fwd, bwd], axis=-1), (1, 0, 2))


def _ref_forward(x, params):
    h1 = _bilstm_ref(x, params["lstm1"])
    h2 = _bilstm_ref(h1, params["lstm2"])
    hp = params["head"]
    l1 = jnp.maximum(h1 @ hp["w1"] + hp["b1"], 0.0)
    l2 = jnp.maximum(h2 @ hp["w2"] + hp["b2"], 0.0)
    hidden = h1 + h2 + l1 + l2
    return hidden @ hp["w"] + hp["b"]


if __name__ == "__main__":
    # Small shapes consistent with the module's forward: x is (B, T, embed_size)
    B, T = 2, 8
    EMBED = 64
    HIDDEN = 32
    N_CLASSES = 5

    key = jax.random.PRNGKey(0)
    kx, kp = jax.random.split(key)
    x = jax.random.normal(kx, (B, T, EMBED), jnp.float32)
    params = init_params(kp, EMBED, HIDDEN, N_CLASSES)

    # Weight prep runs ONCE here (model-load time), outside the jitted forward.
    prepped = prepare_params(params, N_CLASSES)
    prepped = jax.tree_util.tree_map(jax.block_until_ready, prepped)

    fwd = jax.jit(functools.partial(hemo_lstm_basic, n_classes=N_CLASSES))
    out = jax.block_until_ready(fwd(x, prepped))
    assert out.shape == (B, T, N_CLASSES)

    ref = _ref_forward(x, params)
    # Tolerance accounts for the bf16 single-pass MXU recurrent matmul (16 serial
    # steps x 2 layers); with RECURRENT_MM_DTYPE = jnp.float32 this matches the
    # f32 reference to ~1e-3.
    tol = 1e-3 if RECURRENT_MM_DTYPE == jnp.float32 else 3e-2
    assert jnp.allclose(out, ref, atol=tol, rtol=tol), "mismatch vs JAX reference"

    print("KERNEL_OK")
</pallas_src>

<mosaic_0001>
module attributes {stable_mosaic.version = 11 : i64} {
  func.func @_fused_kernel(%arg0: memref<16x64xf32, #tpu.memory_space<vmem>>, %arg1: memref<16x64xf32, #tpu.memory_space<vmem>>, %arg2: memref<64x256xf32, #tpu.memory_space<vmem>>, %arg3: memref<64x256xf32, #tpu.memory_space<vmem>>, %arg4: memref<1x256xf32, #tpu.memory_space<vmem>>, %arg5: memref<64x256xbf16, #tpu.memory_space<vmem>>, %arg6: memref<64x256xf32, #tpu.memory_space<vmem>>, %arg7: memref<64x256xf32, #tpu.memory_space<vmem>>, %arg8: memref<1x256xf32, #tpu.memory_space<vmem>>, %arg9: memref<64x256xbf16, #tpu.memory_space<vmem>>, %arg10: memref<64x64xf32, #tpu.memory_space<vmem>>, %arg11: memref<1x64xf32, #tpu.memory_space<vmem>>, %arg12: memref<64x64xf32, #tpu.memory_space<vmem>>, %arg13: memref<1x64xf32, #tpu.memory_space<vmem>>, %arg14: memref<64x128xf32, #tpu.memory_space<vmem>>, %arg15: memref<1x128xf32, #tpu.memory_space<vmem>>, %arg16: memref<16x128xf32, #tpu.memory_space<vmem>>) attributes {dimension_semantics = [], scalar_prefetch = 0 : i64, scratch_operands = 0 : i64, tpu.core_type = #tpu.core_type<tc>} {
    %0 = tpu.iota {dimensions = array<i32: 1>} : vector<2x256xi32>
    %c128_i32 = arith.constant 128 : i32
    %1 = vector.broadcast %c128_i32 : i32 to vector<2x256xi32>
    %2 = arith.cmpi sge, %0, %1 : vector<2x256xi32>
    %c192_i32 = arith.constant 192 : i32
    %3 = vector.broadcast %c192_i32 : i32 to vector<2x256xi32>
    %4 = arith.cmpi slt, %0, %3 : vector<2x256xi32>
    %5 = arith.andi %2, %4 : vector<2x256xi1>
    %cst = arith.constant 1.000000e+00 : f32
    %cst_0 = arith.constant 5.000000e-01 : f32
    %6 = vector.broadcast %cst : f32 to vector<2x256xf32>
    %7 = vector.broadcast %cst_0 : f32 to vector<2x256xf32>
    %8 = arith.select %5, %6, %7 : vector<2x256xi1>, vector<2x256xf32>
    %cst_1 = arith.constant 0.000000e+00 : f32
    %cst_2 = arith.constant 5.000000e-01 : f32
    %9 = vector.broadcast %cst_1 : f32 to vector<2x256xf32>
    %10 = vector.broadcast %cst_2 : f32 to vector<2x256xf32>
    %11 = arith.select %5, %9, %10 : vector<2x256xi1>, vector<2x256xf32>
    %12 = tpu.iota {dimensions = array<i32: 1>} : vector<2x64xi32>
    %c32_i32 = arith.constant 32 : i32
    %13 = vector.broadcast %c32_i32 : i32 to vector<2x64xi32>
    %14 = arith.cmpi slt, %12, %13 : vector<2x64xi32>
    %c0 = arith.constant 0 : index
    %c0_3 = arith.constant 0 : index
    %15 = vector.load %arg0[%c0, %c0_3] : memref<16x64xf32, #tpu.memory_space<vmem>>, vector<16x64xf32>
    %c0_4 = arith.constant 0 : index
    %c0_5 = arith.constant 0 : index
    %16 = vector.load %arg1[%c0_4, %c0_5] : memref<16x64xf32, #tpu.memory_space<vmem>>, vector<16x64xf32>
    %c0_6 = arith.constant 0 : index
    %c0_7 = arith.constant 0 : index
    %17 = vector.load %arg2[%c0_6, %c0_7] : memref<64x256xf32, #tpu.memory_space<vmem>>, vector<64x256xf32>
    %cst_8 = arith.constant dense<0.000000e+00> : vector<16x256xf32>
    %18 = tpu.matmul %15, %17, %cst_8 {dimension_numbers = #tpu.dot_dimension_numbers<[1], [0], [0], [1], [0, 0, 1, 1], [], []>} : vector<16x64xf32>, vector<64x256xf32>, vector<16x256xf32> -> vector<16x256xf32>
    %c0_9 = arith.constant 0 : index
    %c0_10 = arith.constant 0 : index
    %19 = vector.load %arg3[%c0_9, %c0_10] : memref<64x256xf32, #tpu.memory_space<vmem>>, vector<64x256xf32>
    %cst_11 = arith.constant dense<0.000000e+00> : vector<16x256xf32>
    %20 = tpu.matmul %16, %19, %cst_11 {dimension_numbers = #tpu.dot_dimension_numbers<[1], [0], [0], [1], [0, 0, 1, 1], [], []>} : vector<16x64xf32>, vector<64x256xf32>, vector<16x256xf32> -> vector<16x256xf32>
    %21 = arith.addf %18, %20 : vector<16x256xf32>
    %c0_12 = arith.constant 0 : index
    %c0_13 = arith.constant 0 : index
    %22 = vector.load %arg4[%c0_12, %c0_13] : memref<1x256xf32, #tpu.memory_space<vmem>>, vector<1x256xf32>
    %23 = vector.broadcast %22 : vector<1x256xf32> to vector<16x256xf32>
    %24 = arith.addf %21, %23 : vector<16x256xf32>
    %c0_14 = arith.constant 0 : index
    %c0_15 = arith.constant 0 : index
    %25 = vector.load %arg5[%c0_14, %c0_15] : memref<64x256xbf16, #tpu.memory_space<vmem>>, vector<64x256xbf16>
    %cst_16 = arith.constant 0.000000e+00 : f32
    %26 = vector.broadcast %cst_16 : f32 to vector<2x64xf32>
    %cst_17 = arith.constant 0.000000e+00 : f32
    %27 = vector.broadcast %cst_17 : f32 to vector<2x64xf32>
    %28 = arith.truncf %26 : vector<2x64xf32> to vector<2x64xbf16>
    %cst_18 = arith.constant dense<0.000000e+00> : vector<2x256xf32>
    %29 = tpu.matmul %28, %25, %cst_18 {dimension_numbers = #tpu.dot_dimension_numbers<[1], [0], [0], [1], [0, 0, 1, 1], [], []>} : vector<2x64xbf16>, vector<64x256xbf16>, vector<2x256xf32> -> vector<2x256xf32>
    %30 = vector.extract_strided_slice %24 {offsets = [0, 0], sizes = [2, 256], strides = [1, 1]} : vector<16x256xf32> to vector<2x256xf32>
    %31 = arith.addf %29, %30 : vector<2x256xf32>
    %32 = math.tanh %31 : vector<2x256xf32>
    %33 = arith.mulf %32, %8 : vector<2x256xf32>
    %34 = arith.addf %33, %11 : vector<2x256xf32>
    %35 = vector.extract_strided_slice %34 {offsets = [0, 0], sizes = [2, 64], strides = [1, 1]} : vector<2x256xf32> to vector<2x64xf32>
    %36 = vector.extract_strided_slice %34 {offsets = [0, 64], sizes = [2, 64], strides = [1, 1]} : vector<2x256xf32> to vector<2x64xf32>
    %37 = vector.extract_strided_slice %34 {offsets = [0, 128], sizes = [2, 64], strides = [1, 1]} : vector<2x256xf32> to vector<2x64xf32>
    %38 = vector.extract_strided_slice %34 {offsets = [0, 192], sizes = [2, 64], strides = [1, 1]} : vector<2x256xf32> to vector<2x64xf32>
    %39 = arith.mulf %36, %27 : vector<2x64xf32>
    %40 = arith.mulf %35, %37 : vector<2x64xf32>
    %41 = arith.addf %39, %40 : vector<2x64xf32>
    %42 = math.tanh %41 : vector<2x64xf32>
    %43 = arith.mulf %38, %42 : vector<2x64xf32>
    %44 = arith.truncf %43 : vector<2x64xf32> to vector<2x64xbf16>
    %cst_19 = arith.constant dense<0.000000e+00> : vector<2x256xf32>
    %45 = tpu.matmul %44, %25, %cst_19 {dimension_numbers = #tpu.dot_dimension_numbers<[1], [0], [0], [1], [0, 0, 1, 1], [], []>} : vector<2x64xbf16>, vector<64x256xbf16>, vector<2x256xf32> -> vector<2x256xf32>
    %46 = vector.extract_strided_slice %24 {offsets = [2, 0], sizes = [2, 256], strides = [1, 1]} : vector<16x256xf32> to vector<2x256xf32>
    %47 = arith.addf %45, %46 : vector<2x256xf32>
    %48 = math.tanh %47 : vector<2x256xf32>
    %49 = arith.mulf %48, %8 : vector<2x256xf32>
    %50 = arith.addf %49, %11 : vector<2x256xf32>
    %51 = vector.extract_strided_slice %50 {offsets = [0, 0], sizes = [2, 64], strides = [1, 1]} : vector<2x256xf32> to vector<2x64xf32>
    %52 = vector.extract_strided_slice %50 {offsets = [0, 64], sizes = [2, 64], strides = [1, 1]} : vector<2x256xf32> to vector<2x64xf32>
    %53 = vector.extract_strided_slice %50 {offsets = [0, 128], sizes = [2, 64], strides = [1, 1]} : vector<2x256xf32> to vector<2x64xf32>
    %54 = vector.extract_strided_slice %50 {offsets = [0, 192], sizes = [2, 64], strides = [1, 1]} : vector<2x256xf32> to vector<2x64xf32>
    %55 = arith.mulf %52, %41 : vector<2x64xf32>
    %56 = arith.mulf %51, %53 : vector<2x64xf32>
    %57 = arith.addf %55, %56 : vector<2x64xf32>
    %58 = math.tanh %57 : vector<2x64xf32>
    %59 = arith.mulf %54, %58 : vector<2x64xf32>
    %60 = arith.truncf %59 : vector<2x64xf32> to vector<2x64xbf16>
    %cst_20 = arith.constant dense<0.000000e+00> : vector<2x256xf32>
    %61 = tpu.matmul %60, %25, %cst_20 {dimension_numbers = #tpu.dot_dimension_numbers<[1], [0], [0], [1], [0, 0, 1, 1], [], []>} : vector<2x64xbf16>, vector<64x256xbf16>, vector<2x256xf32> -> vector<2x256xf32>
    %62 = vector.extract_strided_slice %24 {offsets = [4, 0], sizes = [2, 256], strides = [1, 1]} : vector<16x256xf32> to vector<2x256xf32>
    %63 = arith.addf %61, %62 : vector<2x256xf32>
    %64 = math.tanh %63 : vector<2x256xf32>
    %65 = arith.mulf %64, %8 : vector<2x256xf32>
    %66 = arith.addf %65, %11 : vector<2x256xf32>
    %67 = vector.extract_strided_slice %66 {offsets = [0, 0], sizes = [2, 64], strides = [1, 1]} : vector<2x256xf32> to vector<2x64xf32>
    %68 = vector.extract_strided_slice %66 {offsets = [0, 64], sizes = [2, 64], strides = [1, 1]} : vector<2x256xf32> to vector<2x64xf32>
    %69 = vector.extract_strided_slice %66 {offsets = [0, 128], sizes = [2, 64], strides = [1, 1]} : vector<2x256xf32> to vector<2x64xf32>
    %70 = vector.extract_strided_slice %66 {offsets = [0, 192], sizes = [2, 64], strides = [1, 1]} : vector<2x256xf32> to vector<2x64xf32>
    %71 = arith.mulf %68, %57 : vector<2x64xf32>
    %72 = arith.mulf %67, %69 : vector<2x64xf32>
    %73 = arith.addf %71, %72 : vector<2x64xf32>
    %74 = math.tanh %73 : vector<2x64xf32>
    %75 = arith.mulf %70, %74 : vector<2x64xf32>
    %76 = arith.truncf %75 : vector<2x64xf32> to vector<2x64xbf16>
    %cst_21 = arith.constant dense<0.000000e+00> : vector<2x256xf32>
    %77 = tpu.matmul %76, %25, %cst_21 {dimension_numbers = #tpu.dot_dimension_numbers<[1], [0], [0], [1], [0, 0, 1, 1], [], []>} : vector<2x64xbf16>, vector<64x256xbf16>, vector<2x256xf32> -> vector<2x256xf32>
    %78 = vector.extract_strided_slice %24 {offsets = [6, 0], sizes = [2, 256], strides = [1, 1]} : vector<16x256xf32> to vector<2x256xf32>
    %79 = arith.addf %77, %78 : vector<2x256xf32>
    %80 = math.tanh %79 : vector<2x256xf32>
    %81 = arith.mulf %80, %8 : vector<2x256xf32>
    %82 = arith.addf %81, %11 : vector<2x256xf32>
    %83 = vector.extract_strided_slice %82 {offsets = [0, 0], sizes = [2, 64], strides = [1, 1]} : vector<2x256xf32> to vector<2x64xf32>
    %84 = vector.extract_strided_slice %82 {offsets = [0, 64], sizes = [2, 64], strides = [1, 1]} : vector<2x256xf32> to vector<2x64xf32>
    %85 = vector.extract_strided_slice %82 {offsets = [0, 128], sizes = [2, 64], strides = [1, 1]} : vector<2x256xf32> to vector<2x64xf32>
    %86 = vector.extract_strided_slice %82 {offsets = [0, 192], sizes = [2, 64], strides = [1, 1]} : vector<2x256xf32> to vector<2x64xf32>
    %87 = arith.mulf %84, %73 : vector<2x64xf32>
    %88 = arith.mulf %83, %85 : vector<2x64xf32>
    %89 = arith.addf %87, %88 : vector<2x64xf32>
    %90 = math.tanh %89 : vector<2x64xf32>
    %91 = arith.mulf %86, %90 : vector<2x64xf32>
    %92 = arith.truncf %91 : vector<2x64xf32> to vector<2x64xbf16>
    %cst_22 = arith.constant dense<0.000000e+00> : vector<2x256xf32>
    %93 = tpu.matmul %92, %25, %cst_22 {dimension_numbers = #tpu.dot_dimension_numbers<[1], [0], [0], [1], [0, 0, 1, 1], [], []>} : vector<2x64xbf16>, vector<64x256xbf16>, vector<2x256xf32> -> vector<2x256xf32>
    %94 = vector.extract_strided_slice %24 {offsets = [8, 0], sizes = [2, 256], strides = [1, 1]} : vector<16x256xf32> to vector<2x256xf32>
    %95 = arith.addf %93, %94 : vector<2x256xf32>
    %96 = math.tanh %95 : vector<2x256xf32>
    %97 = arith.mulf %96, %8 : vector<2x256xf32>
    %98 = arith.addf %97, %11 : vector<2x256xf32>
    %99 = vector.extract_strided_slice %98 {offsets = [0, 0], sizes = [2, 64], strides = [1, 1]} : vector<2x256xf32> to vector<2x64xf32>
    %100 = vector.extract_strided_slice %98 {offsets = [0, 64], sizes = [2, 64], strides = [1, 1]} : vector<2x256xf32> to vector<2x64xf32>
    %101 = vector.extract_strided_slice %98 {offsets = [0, 128], sizes = [2, 64], strides = [1, 1]} : vector<2x256xf32> to vector<2x64xf32>
    %102 = vector.extract_strided_slice %98 {offsets = [0, 192], sizes = [2, 64], strides = [1, 1]} : vector<2x256xf32> to vector<2x64xf32>
    %103 = arith.mulf %100, %89 : vector<2x64xf32>
    %104 = arith.mulf %99, %101 : vector<2x64xf32>
    %105 = arith.addf %103, %104 : vector<2x64xf32>
    %106 = math.tanh %105 : vector<2x64xf32>
    %107 = arith.mulf %102, %106 : vector<2x64xf32>
    %108 = arith.truncf %107 : vector<2x64xf32> to vector<2x64xbf16>
    %cst_23 = arith.constant dense<0.000000e+00> : vector<2x256xf32>
    %109 = tpu.matmul %108, %25, %cst_23 {dimension_numbers = #tpu.dot_dimension_numbers<[1], [0], [0], [1], [0, 0, 1, 1], [], []>} : vector<2x64xbf16>, vector<64x256xbf16>, vector<2x256xf32> -> vector<2x256xf32>
    %110 = vector.extract_strided_slice %24 {offsets = [10, 0], sizes = [2, 256], strides = [1, 1]} : vector<16x256xf32> to vector<2x256xf32>
    %111 = arith.addf %109, %110 : vector<2x256xf32>
    %112 = math.tanh %111 : vector<2x256xf32>
    %113 = arith.mulf %112, %8 : vector<2x256xf32>
    %114 = arith.addf %113, %11 : vector<2x256xf32>
    %115 = vector.extract_strided_slice %114 {offsets = [0, 0], sizes = [2, 64], strides = [1, 1]} : vector<2x256xf32> to vector<2x64xf32>
    %116 = vector.extract_strided_slice %114 {offsets = [0, 64], sizes = [2, 64], strides = [1, 1]} : vector<2x256xf32> to vector<2x64xf32>
    %117 = vector.extract_strided_slice %114 {offsets = [0, 128], sizes = [2, 64], strides = [1, 1]} : vector<2x256xf32> to vector<2x64xf32>
    %118 = vector.extract_strided_slice %114 {offsets = [0, 192], sizes = [2, 64], strides = [1, 1]} : vector<2x256xf32> to vector<2x64xf32>
    %119 = arith.mulf %116, %105 : vector<2x64xf32>
    %120 = arith.mulf %115, %117 : vector<2x64xf32>
    %121 = arith.addf %119, %120 : vector<2x64xf32>
    %122 = math.tanh %121 : vector<2x64xf32>
    %123 = arith.mulf %118, %122 : vector<2x64xf32>
    %124 = arith.truncf %123 : vector<2x64xf32> to vector<2x64xbf16>
    %cst_24 = arith.constant dense<0.000000e+00> : vector<2x256xf32>
    %125 = tpu.matmul %124, %25, %cst_24 {dimension_numbers = #tpu.dot_dimension_numbers<[1], [0], [0], [1], [0, 0, 1, 1], [], []>} : vector<2x64xbf16>, vector<64x256xbf16>, vector<2x256xf32> -> vector<2x256xf32>
    %126 = vector.extract_strided_slice %24 {offsets = [12, 0], sizes = [2, 256], strides = [1, 1]} : vector<16x256xf32> to vector<2x256xf32>
    %127 = arith.addf %125, %126 : vector<2x256xf32>
    %128 = math.tanh %127 : vector<2x256xf32>
    %129 = arith.mulf %128, %8 : vector<2x256xf32>
    %130 = arith.addf %129, %11 : vector<2x256xf32>
    %131 = vector.extract_strided_slice %130 {offsets = [0, 0], sizes = [2, 64], strides = [1, 1]} : vector<2x256xf32> to vector<2x64xf32>
    %132 = vector.extract_strided_slice %130 {offsets = [0, 64], sizes = [2, 64], strides = [1, 1]} : vector<2x256xf32> to vector<2x64xf32>
    %133 = vector.extract_strided_slice %130 {offsets = [0, 128], sizes = [2, 64], strides = [1, 1]} : vector<2x256xf32> to vector<2x64xf32>
    %134 = vector.extract_strided_slice %130 {offsets = [0, 192], sizes = [2, 64], strides = [1, 1]} : vector<2x256xf32> to vector<2x64xf32>
    %135 = arith.mulf %132, %121 : vector<2x64xf32>
    %136 = arith.mulf %131, %133 : vector<2x64xf32>
    %137 = arith.addf %135, %136 : vector<2x64xf32>
    %138 = math.tanh %137 : vector<2x64xf32>
    %139 = arith.mulf %134, %138 : vector<2x64xf32>
    %140 = arith.truncf %139 : vector<2x64xf32> to vector<2x64xbf16>
    %cst_25 = arith.constant dense<0.000000e+00> : vector<2x256xf32>
    %141 = tpu.matmul %140, %25, %cst_25 {dimension_numbers = #tpu.dot_dimension_numbers<[1], [0], [0], [1], [0, 0, 1, 1], [], []>} : vector<2x64xbf16>, vector<64x256xbf16>, vector<2x256xf32> -> vector<2x256xf32>
    %142 = vector.extract_strided_slice %24 {offsets = [14, 0], sizes = [2, 256], strides = [1, 1]} : vector<16x256xf32> to vector<2x256xf32>
    %143 = arith.addf %141, %142 : vector<2x256xf32>
    %144 = math.tanh %143 : vector<2x256xf32>
    %145 = arith.mulf %144, %8 : vector<2x256xf32>
    %146 = arith.addf %145, %11 : vector<2x256xf32>
    %147 = vector.extract_strided_slice %146 {offsets = [0, 0], sizes = [2, 64], strides = [1, 1]} : vector<2x256xf32> to vector<2x64xf32>
    %148 = vector.extract_strided_slice %146 {offsets = [0, 64], sizes = [2, 64], strides = [1, 1]} : vector<2x256xf32> to vector<2x64xf32>
    %149 = vector.extract_strided_slice %146 {offsets = [0, 128], sizes = [2, 64], strides = [1, 1]} : vector<2x256xf32> to vector<2x64xf32>
    %150 = vector.extract_strided_slice %146 {offsets = [0, 192], sizes = [2, 64], strides = [1, 1]} : vector<2x256xf32> to vector<2x64xf32>
    %151 = arith.mulf %148, %137 : vector<2x64xf32>
    %152 = arith.mulf %147, %149 : vector<2x64xf32>
    %153 = arith.addf %151, %152 : vector<2x64xf32>
    %154 = math.tanh %153 : vector<2x64xf32>
    %155 = arith.mulf %150, %154 : vector<2x64xf32>
    %156 = arith.select %14, %43, %155 : vector<2x64xi1>, vector<2x64xf32>
    %157 = arith.select %14, %59, %139 : vector<2x64xi1>, vector<2x64xf32>
    %158 = arith.select %14, %75, %123 : vector<2x64xi1>, vector<2x64xf32>
    %159 = arith.select %14, %91, %107 : vector<2x64xi1>, vector<2x64xf32>
    %160 = arith.select %14, %107, %91 : vector<2x64xi1>, vector<2x64xf32>
    %161 = arith.select %14, %123, %75 : vector<2x64xi1>, vector<2x64xf32>
    %162 = arith.select %14, %139, %59 : vector<2x64xi1>, vector<2x64xf32>
    %163 = arith.select %14, %155, %43 : vector<2x64xi1>, vector<2x64xf32>
    %164 = tpu.concatenate %156, %157, %158, %159, %160, %161, %162, %163 in 0 : vector<2x64xf32>, vector<2x64xf32>, vector<2x64xf32>, vector<2x64xf32>, vector<2x64xf32>, vector<2x64xf32>, vector<2x64xf32>, vector<2x64xf32> -> vector<16x64xf32>
    %165 = tpu.concatenate %163, %162, %161, %160, %159, %158, %157, %156 in 0 : vector<2x64xf32>, vector<2x64xf32>, vector<2x64xf32>, vector<2x64xf32>, vector<2x64xf32>, vector<2x64xf32>, vector<2x64xf32>, vector<2x64xf32> -> vector<16x64xf32>
    %c0_26 = arith.constant 0 : index
    %c0_27 = arith.constant 0 : index
    %166 = vector.load %arg6[%c0_26, %c0_27] : memref<64x256xf32, #tpu.memory_space<vmem>>, vector<64x256xf32>
    %cst_28 = arith.constant dense<0.000000e+00> : vector<16x256xf32>
    %167 = tpu.matmul %164, %166, %cst_28 {dimension_numbers = #tpu.dot_dimension_numbers<[1], [0], [0], [1], [0, 0, 1, 1], [], []>} : vector<16x64xf32>, vector<64x256xf32>, vector<16x256xf32> -> vector<16x256xf32>
    %c0_29 = arith.constant 0 : index
    %c0_30 = arith.constant 0 : index
    %168 = vector.load %arg7[%c0_29, %c0_30] : memref<64x256xf32, #tpu.memory_space<vmem>>, vector<64x256xf32>
    %cst_31 = arith.constant dense<0.000000e+00> : vector<16x256xf32>
    %169 = tpu.matmul %165, %168, %cst_31 {dimension_numbers = #tpu.dot_dimension_numbers<[1], [0], [0], [1], [0, 0, 1, 1], [], []>} : vector<16x64xf32>, vector<64x256xf32>, vector<16x256xf32> -> vector<16x256xf32>
    %170 = arith.addf %167, %169 : vector<16x256xf32>
    %c0_32 = arith.constant 0 : index
    %c0_33 = arith.constant 0 : index
    %171 = vector.load %arg8[%c0_32, %c0_33] : memref<1x256xf32, #tpu.memory_space<vmem>>, vector<1x256xf32>
    %172 = vector.broadcast %171 : vector<1x256xf32> to vector<16x256xf32>
    %173 = arith.addf %170, %172 : vector<16x256xf32>
    %c0_34 = arith.constant 0 : index
    %c0_35 = arith.constant 0 : index
    %174 = vector.load %arg9[%c0_34, %c0_35] : memref<64x256xbf16, #tpu.memory_space<vmem>>, vector<64x256xbf16>
    %cst_36 = arith.constant 0.000000e+00 : f32
    %175 = vector.broadcast %cst_36 : f32 to vector<2x64xf32>
    %cst_37 = arith.constant 0.000000e+00 : f32
    %176 = vector.broadcast %cst_37 : f32 to vector<2x64xf32>
    %177 = arith.truncf %175 : vector<2x64xf32> to vector<2x64xbf16>
    %cst_38 = arith.constant dense<0.000000e+00> : vector<2x256xf32>
    %178 = tpu.matmul %177, %174, %cst_38 {dimension_numbers = #tpu.dot_dimension_numbers<[1], [0], [0], [1], [0, 0, 1, 1], [], []>} : vector<2x64xbf16>, vector<64x256xbf16>, vector<2x256xf32> -> vector<2x256xf32>
    %179 = vector.extract_strided_slice %173 {offsets = [0, 0], sizes = [2, 256], strides = [1, 1]} : vector<16x256xf32> to vector<2x256xf32>
    %180 = arith.addf %178, %179 : vector<2x256xf32>
    %181 = math.tanh %180 : vector<2x256xf32>
    %182 = arith.mulf %181, %8 : vector<2x256xf32>
    %183 = arith.addf %182, %11 : vector<2x256xf32>
    %184 = vector.extract_strided_slice %183 {offsets = [0, 0], sizes = [2, 64], strides = [1, 1]} : vector<2x256xf32> to vector<2x64xf32>
    %185 = vector.extract_strided_slice %183 {offsets = [0, 64], sizes = [2, 64], strides = [1, 1]} : vector<2x256xf32> to vector<2x64xf32>
    %186 = vector.extract_strided_slice %183 {offsets = [0, 128], sizes = [2, 64], strides = [1, 1]} : vector<2x256xf32> to vector<2x64xf32>
    %187 = vector.extract_strided_slice %183 {offsets = [0, 192], sizes = [2, 64], strides = [1, 1]} : vector<2x256xf32> to vector<2x64xf32>
    %188 = arith.mulf %185, %176 : vector<2x64xf32>
    %189 = arith.mulf %184, %186 : vector<2x64xf32>
    %190 = arith.addf %188, %189 : vector<2x64xf32>
    %191 = math.tanh %190 : vector<2x64xf32>
    %192 = arith.mulf %187, %191 : vector<2x64xf32>
    %193 = arith.truncf %192 : vector<2x64xf32> to vector<2x64xbf16>
    %cst_39 = arith.constant dense<0.000000e+00> : vector<2x256xf32>
    %194 = tpu.matmul %193, %174, %cst_39 {dimension_numbers = #tpu.dot_dimension_numbers<[1], [0], [0], [1], [0, 0, 1, 1], [], []>} : vector<2x64xbf16>, vector<64x256xbf16>, vector<2x256xf32> -> vector<2x256xf32>
    %195 = vector.extract_strided_slice %173 {offsets = [2, 0], sizes = [2, 256], strides = [1, 1]} : vector<16x256xf32> to vector<2x256xf32>
    %196 = arith.addf %194, %195 : vector<2x256xf32>
    %197 = math.tanh %196 : vector<2x256xf32>
    %198 = arith.mulf %197, %8 : vector<2x256xf32>
    %199 = arith.addf %198, %11 : vector<2x256xf32>
    %200 = vector.extract_strided_slice %199 {offsets = [0, 0], sizes = [2, 64], strides = [1, 1]} : vector<2x256xf32> to vector<2x64xf32>
    %201 = vector.extract_strided_slice %199 {offsets = [0, 64], sizes = [2, 64], strides = [1, 1]} : vector<2x256xf32> to vector<2x64xf32>
    %202 = vector.extract_strided_slice %199 {offsets = [0, 128], sizes = [2, 64], strides = [1, 1]} : vector<2x256xf32> to vector<2x64xf32>
    %203 = vector.extract_strided_slice %199 {offsets = [0, 192], sizes = [2, 64], strides = [1, 1]} : vector<2x256xf32> to vector<2x64xf32>
    %204 = arith.mulf %201, %190 : vector<2x64xf32>
    %205 = arith.mulf %200, %202 : vector<2x64xf32>
    %206 = arith.addf %204, %205 : vector<2x64xf32>
    %207 = math.tanh %206 : vector<2x64xf32>
    %208 = arith.mulf %203, %207 : vector<2x64xf32>
    %209 = arith.truncf %208 : vector<2x64xf32> to vector<2x64xbf16>
    %cst_40 = arith.constant dense<0.000000e+00> : vector<2x256xf32>
    %210 = tpu.matmul %209, %174, %cst_40 {dimension_numbers = #tpu.dot_dimension_numbers<[1], [0], [0], [1], [0, 0, 1, 1], [], []>} : vector<2x64xbf16>, vector<64x256xbf16>, vector<2x256xf32> -> vector<2x256xf32>
    %211 = vector.extract_strided_slice %173 {offsets = [4, 0], sizes = [2, 256], strides = [1, 1]} : vector<16x256xf32> to vector<2x256xf32>
    %212 = arith.addf %210, %211 : vector<2x256xf32>
    %213 = math.tanh %212 : vector<2x256xf32>
    %214 = arith.mulf %213, %8 : vector<2x256xf32>
    %215 = arith.addf %214, %11 : vector<2x256xf32>
    %216 = vector.extract_strided_slice %215 {offsets = [0, 0], sizes = [2, 64], strides = [1, 1]} : vector<2x256xf32> to vector<2x64xf32>
    %217 = vector.extract_strided_slice %215 {offsets = [0, 64], sizes = [2, 64], strides = [1, 1]} : vector<2x256xf32> to vector<2x64xf32>
    %218 = vector.extract_strided_slice %215 {offsets = [0, 128], sizes = [2, 64], strides = [1, 1]} : vector<2x256xf32> to vector<2x64xf32>
    %219 = vector.extract_strided_slice %215 {offsets = [0, 192], sizes = [2, 64], strides = [1, 1]} : vector<2x256xf32> to vector<2x64xf32>
    %220 = arith.mulf %217, %206 : vector<2x64xf32>
    %221 = arith.mulf %216, %218 : vector<2x64xf32>
    %222 = arith.addf %220, %221 : vector<2x64xf32>
    %223 = math.tanh %222 : vector<2x64xf32>
    %224 = arith.mulf %219, %223 : vector<2x64xf32>
    %225 = arith.truncf %224 : vector<2x64xf32> to vector<2x64xbf16>
    %cst_41 = arith.constant dense<0.000000e+00> : vector<2x256xf32>
    %226 = tpu.matmul %225, %174, %cst_41 {dimension_numbers = #tpu.dot_dimension_numbers<[1], [0], [0], [1], [0, 0, 1, 1], [], []>} : vector<2x64xbf16>, vector<64x256xbf16>, vector<2x256xf32> -> vector<2x256xf32>
    %227 = vector.extract_strided_slice %173 {offsets = [6, 0], sizes = [2, 256], strides = [1, 1]} : vector<16x256xf32> to vector<2x256xf32>
    %228 = arith.addf %226, %227 : vector<2x256xf32>
    %229 = math.tanh %228 : vector<2x256xf32>
    %230 = arith.mulf %229, %8 : vector<2x256xf32>
    %231 = arith.addf %230, %11 : vector<2x256xf32>
    %232 = vector.extract_strided_slice %231 {offsets = [0, 0], sizes = [2, 64], strides = [1, 1]} : vector<2x256xf32> to vector<2x64xf32>
    %233 = vector.extract_strided_slice %231 {offsets = [0, 64], sizes = [2, 64], strides = [1, 1]} : vector<2x256xf32> to vector<2x64xf32>
    %234 = vector.extract_strided_slice %231 {offsets = [0, 128], sizes = [2, 64], strides = [1, 1]} : vector<2x256xf32> to vector<2x64xf32>
    %235 = vector.extract_strided_slice %231 {offsets = [0, 192], sizes = [2, 64], strides = [1, 1]} : vector<2x256xf32> to vector<2x64xf32>
    %236 = arith.mulf %233, %222 : vector<2x64xf32>
    %237 = arith.mulf %232, %234 : vector<2x64xf32>
    %238 = arith.addf %236, %237 : vector<2x64xf32>
    %239 = math.tanh %238 : vector<2x64xf32>
    %240 = arith.mulf %235, %239 : vector<2x64xf32>
    %241 = arith.truncf %240 : vector<2x64xf32> to vector<2x64xbf16>
    %cst_42 = arith.constant dense<0.000000e+00> : vector<2x256xf32>
    %242 = tpu.matmul %241, %174, %cst_42 {dimension_numbers = #tpu.dot_dimension_numbers<[1], [0], [0], [1], [0, 0, 1, 1], [], []>} : vector<2x64xbf16>, vector<64x256xbf16>, vector<2x256xf32> -> vector<2x256xf32>
    %243 = vector.extract_strided_slice %173 {offsets = [8, 0], sizes = [2, 256], strides = [1, 1]} : vector<16x256xf32> to vector<2x256xf32>
    %244 = arith.addf %242, %243 : vector<2x256xf32>
    %245 = math.tanh %244 : vector<2x256xf32>
    %246 = arith.mulf %245, %8 : vector<2x256xf32>
    %247 = arith.addf %246, %11 : vector<2x256xf32>
    %248 = vector.extract_strided_slice %247 {offsets = [0, 0], sizes = [2, 64], strides = [1, 1]} : vector<2x256xf32> to vector<2x64xf32>
    %249 = vector.extract_strided_slice %247 {offsets = [0, 64], sizes = [2, 64], strides = [1, 1]} : vector<2x256xf32> to vector<2x64xf32>
    %250 = vector.extract_strided_slice %247 {offsets = [0, 128], sizes = [2, 64], strides = [1, 1]} : vector<2x256xf32> to vector<2x64xf32>
    %251 = vector.extract_strided_slice %247 {offsets = [0, 192], sizes = [2, 64], strides = [1, 1]} : vector<2x256xf32> to vector<2x64xf32>
    %252 = arith.mulf %249, %238 : vector<2x64xf32>
    %253 = arith.mulf %248, %250 : vector<2x64xf32>
    %254 = arith.addf %252, %253 : vector<2x64xf32>
    %255 = math.tanh %254 : vector<2x64xf32>
    %256 = arith.mulf %251, %255 : vector<2x64xf32>
    %257 = arith.truncf %256 : vector<2x64xf32> to vector<2x64xbf16>
    %cst_43 = arith.constant dense<0.000000e+00> : vector<2x256xf32>
    %258 = tpu.matmul %257, %174, %cst_43 {dimension_numbers = #tpu.dot_dimension_numbers<[1], [0], [0], [1], [0, 0, 1, 1], [], []>} : vector<2x64xbf16>, vector<64x256xbf16>, vector<2x256xf32> -> vector<2x256xf32>
    %259 = vector.extract_strided_slice %173 {offsets = [10, 0], sizes = [2, 256], strides = [1, 1]} : vector<16x256xf32> to vector<2x256xf32>
    %260 = arith.addf %258, %259 : vector<2x256xf32>
    %261 = math.tanh %260 : vector<2x256xf32>
    %262 = arith.mulf %261, %8 : vector<2x256xf32>
    %263 = arith.addf %262, %11 : vector<2x256xf32>
    %264 = vector.extract_strided_slice %263 {offsets = [0, 0], sizes = [2, 64], strides = [1, 1]} : vector<2x256xf32> to vector<2x64xf32>
    %265 = vector.extract_strided_slice %263 {offsets = [0, 64], sizes = [2, 64], strides = [1, 1]} : vector<2x256xf32> to vector<2x64xf32>
    %266 = vector.extract_strided_slice %263 {offsets = [0, 128], sizes = [2, 64], strides = [1, 1]} : vector<2x256xf32> to vector<2x64xf32>
    %267 = vector.extract_strided_slice %263 {offsets = [0, 192], sizes = [2, 64], strides = [1, 1]} : vector<2x256xf32> to vector<2x64xf32>
    %268 = arith.mulf %265, %254 : vector<2x64xf32>
    %269 = arith.mulf %264, %266 : vector<2x64xf32>
    %270 = arith.addf %268, %269 : vector<2x64xf32>
    %271 = math.tanh %270 : vector<2x64xf32>
    %272 = arith.mulf %267, %271 : vector<2x64xf32>
    %273 = arith.truncf %272 : vector<2x64xf32> to vector<2x64xbf16>
    %cst_44 = arith.constant dense<0.000000e+00> : vector<2x256xf32>
    %274 = tpu.matmul %273, %174, %cst_44 {dimension_numbers = #tpu.dot_dimension_numbers<[1], [0], [0], [1], [0, 0, 1, 1], [], []>} : vector<2x64xbf16>, vector<64x256xbf16>, vector<2x256xf32> -> vector<2x256xf32>
    %275 = vector.extract_strided_slice %173 {offsets = [12, 0], sizes = [2, 256], strides = [1, 1]} : vector<16x256xf32> to vector<2x256xf32>
    %276 = arith.addf %274, %275 : vector<2x256xf32>
    %277 = math.tanh %276 : vector<2x256xf32>
    %278 = arith.mulf %277, %8 : vector<2x256xf32>
    %279 = arith.addf %278, %11 : vector<2x256xf32>
    %280 = vector.extract_strided_slice %279 {offsets = [0, 0], sizes = [2, 64], strides = [1, 1]} : vector<2x256xf32> to vector<2x64xf32>
    %281 = vector.extract_strided_slice %279 {offsets = [0, 64], sizes = [2, 64], strides = [1, 1]} : vector<2x256xf32> to vector<2x64xf32>
    %282 = vector.extract_strided_slice %279 {offsets = [0, 128], sizes = [2, 64], strides = [1, 1]} : vector<2x256xf32> to vector<2x64xf32>
    %283 = vector.extract_strided_slice %279 {offsets = [0, 192], sizes = [2, 64], strides = [1, 1]} : vector<2x256xf32> to vector<2x64xf32>
    %284 = arith.mulf %281, %270 : vector<2x64xf32>
    %285 = arith.mulf %280, %282 : vector<2x64xf32>
    %286 = arith.addf %284, %285 : vector<2x64xf32>
    %287 = math.tanh %286 : vector<2x64xf32>
    %288 = arith.mulf %283, %287 : vector<2x64xf32>
    %289 = arith.truncf %288 : vector<2x64xf32> to vector<2x64xbf16>
    %cst_45 = arith.constant dense<0.000000e+00> : vector<2x256xf32>
    %290 = tpu.matmul %289, %174, %cst_45 {dimension_numbers = #tpu.dot_dimension_numbers<[1], [0], [0], [1], [0, 0, 1, 1], [], []>} : vector<2x64xbf16>, vector<64x256xbf16>, vector<2x256xf32> -> vector<2x256xf32>
    %291 = vector.extract_strided_slice %173 {offsets = [14, 0], sizes = [2, 256], strides = [1, 1]} : vector<16x256xf32> to vector<2x256xf32>
    %292 = arith.addf %290, %291 : vector<2x256xf32>
    %293 = math.tanh %292 : vector<2x256xf32>
    %294 = arith.mulf %293, %8 : vector<2x256xf32>
    %295 = arith.addf %294, %11 : vector<2x256xf32>
    %296 = vector.extract_strided_slice %295 {offsets = [0, 0], sizes = [2, 64], strides = [1, 1]} : vector<2x256xf32> to vector<2x64xf32>
    %297 = vector.extract_strided_slice %295 {offsets = [0, 64], sizes = [2, 64], strides = [1, 1]} : vector<2x256xf32> to vector<2x64xf32>
    %298 = vector.extract_strided_slice %295 {offsets = [0, 128], sizes = [2, 64], strides = [1, 1]} : vector<2x256xf32> to vector<2x64xf32>
    %299 = vector.extract_strided_slice %295 {offsets = [0, 192], sizes = [2, 64], strides = [1, 1]} : vector<2x256xf32> to vector<2x64xf32>
    %300 = arith.mulf %297, %286 : vector<2x64xf32>
    %301 = arith.mulf %296, %298 : vector<2x64xf32>
    %302 = arith.addf %300, %301 : vector<2x64xf32>
    %303 = math.tanh %302 : vector<2x64xf32>
    %304 = arith.mulf %299, %303 : vector<2x64xf32>
    %305 = arith.select %14, %192, %304 : vector<2x64xi1>, vector<2x64xf32>
    %306 = arith.select %14, %208, %288 : vector<2x64xi1>, vector<2x64xf32>
    %307 = arith.select %14, %224, %272 : vector<2x64xi1>, vector<2x64xf32>
    %308 = arith.select %14, %240, %256 : vector<2x64xi1>, vector<2x64xf32>
    %309 = arith.select %14, %256, %240 : vector<2x64xi1>, vector<2x64xf32>
    %310 = arith.select %14, %272, %224 : vector<2x64xi1>, vector<2x64xf32>
    %311 = arith.select %14, %288, %208 : vector<2x64xi1>, vector<2x64xf32>
    %312 = arith.select %14, %304, %192 : vector<2x64xi1>, vector<2x64xf32>
    %313 = tpu.concatenate %305, %306, %307, %308, %309, %310, %311, %312 in 0 : vector<2x64xf32>, vector<2x64xf32>, vector<2x64xf32>, vector<2x64xf32>, vector<2x64xf32>, vector<2x64xf32>, vector<2x64xf32>, vector<2x64xf32> -> vector<16x64xf32>
    %c0_46 = arith.constant 0 : index
    %c0_47 = arith.constant 0 : index
    %314 = vector.load %arg10[%c0_46, %c0_47] : memref<64x64xf32, #tpu.memory_space<vmem>>, vector<64x64xf32>
    %cst_48 = arith.constant dense<0.000000e+00> : vector<16x64xf32>
    %315 = tpu.matmul %164, %314, %cst_48 {dimension_numbers = #tpu.dot_dimension_numbers<[1], [0], [0], [1], [0, 0, 1, 1], [], []>} : vector<16x64xf32>, vector<64x64xf32>, vector<16x64xf32> -> vector<16x64xf32>
    %c0_49 = arith.constant 0 : index
    %c0_50 = arith.constant 0 : index
    %316 = vector.load %arg11[%c0_49, %c0_50] : memref<1x64xf32, #tpu.memory_space<vmem>>, vector<1x64xf32>
    %317 = vector.broadcast %316 : vector<1x64xf32> to vector<16x64xf32>
    %318 = arith.addf %315, %317 : vector<16x64xf32>
    %cst_51 = arith.constant 0.000000e+00 : f32
    %319 = vector.broadcast %cst_51 : f32 to vector<16x64xf32>
    %320 = arith.maximumf %318, %319 : vector<16x64xf32>
    %c0_52 = arith.constant 0 : index
    %c0_53 = arith.constant 0 : index
    %321 = vector.load %arg12[%c0_52, %c0_53] : memref<64x64xf32, #tpu.memory_space<vmem>>, vector<64x64xf32>
    %cst_54 = arith.constant dense<0.000000e+00> : vector<16x64xf32>
    %322 = tpu.matmul %313, %321, %cst_54 {dimension_numbers = #tpu.dot_dimension_numbers<[1], [0], [0], [1], [0, 0, 1, 1], [], []>} : vector<16x64xf32>, vector<64x64xf32>, vector<16x64xf32> -> vector<16x64xf32>
    %c0_55 = arith.constant 0 : index
    %c0_56 = arith.constant 0 : index
    %323 = vector.load %arg13[%c0_55, %c0_56] : memref<1x64xf32, #tpu.memory_space<vmem>>, vector<1x64xf32>
    %324 = vector.broadcast %323 : vector<1x64xf32> to vector<16x64xf32>
    %325 = arith.addf %322, %324 : vector<16x64xf32>
    %cst_57 = arith.constant 0.000000e+00 : f32
    %326 = vector.broadcast %cst_57 : f32 to vector<16x64xf32>
    %327 = arith.maximumf %325, %326 : vector<16x64xf32>
    %328 = arith.addf %164, %313 : vector<16x64xf32>
    %329 = arith.addf %328, %320 : vector<16x64xf32>
    %330 = arith.addf %329, %327 : vector<16x64xf32>
    %c0_58 = arith.constant 0 : index
    %c0_59 = arith.constant 0 : index
    %331 = vector.load %arg14[%c0_58, %c0_59] : memref<64x128xf32, #tpu.memory_space<vmem>>, vector<64x128xf32>
    %cst_60 = arith.constant dense<0.000000e+00> : vector<16x128xf32>
    %332 = tpu.matmul %330, %331, %cst_60 {dimension_numbers = #tpu.dot_dimension_numbers<[1], [0], [0], [1], [0, 0, 1, 1], [], []>} : vector<16x64xf32>, vector<64x128xf32>, vector<16x128xf32> -> vector<16x128xf32>
    %c0_61 = arith.constant 0 : index
    %c0_62 = arith.constant 0 : index
    %333 = vector.load %arg15[%c0_61, %c0_62] : memref<1x128xf32, #tpu.memory_space<vmem>>, vector<1x128xf32>
    %334 = vector.broadcast %333 : vector<1x128xf32> to vector<16x128xf32>
    %335 = arith.addf %332, %334 : vector<16x128xf32>
    %c0_63 = arith.constant 0 : index
    %c0_64 = arith.constant 0 : index
    %336 = vector.load %arg16[%c0_63, %c0_64] : memref<16x128xf32, #tpu.memory_space<vmem>>, vector<16x128xf32>
    tpu.vector_store %arg16[%c0_63, %c0_64], %335 {strides = array<i32>} : memref<16x128xf32, #tpu.memory_space<vmem>>, vector<16x128xf32>,
    return
  }
}

</mosaic_0001>

<bundles_post_ra>
// kernel: hemo_lstm_basic.1
= control target key start
LH: loop header
LB: loop body
LE: loop exit
PB: predicated region body
PF: predicated region fallthrough
CT: control target
= control target key end

     0   :  { %s3681_s0 = inlined_call_operand.vmem [shape: f32[16,64], index: 0, kind: input, shape index: {}]   ;;  %s3682_s1 = inlined_call_operand.vmem [shape: f32[16,64], index: 1, kind: input, shape index: {}]   ;;  %s3683_s2 = inlined_call_operand.vmem [shape: f32[64,256], index: 2, kind: input, shape index: {}]   ;;  %s3684_s3 = inlined_call_operand.hbm [shape: f32[64,256], index: 3, kind: input, shape index: {}]   ;;  %s3685_s4 = inlined_call_operand.vmem [shape: f32[1,256], index: 4, kind: input, shape index: {}]   ;;  %s3686_s5 = inlined_call_operand.hbm [shape: bf16[64,256], index: 5, kind: input, shape index: {}]   ;;  %s3687_s6 = inlined_call_operand.hbm [shape: f32[64,256], index: 6, kind: input, shape index: {}]   ;;  %s3688_s7 = inlined_call_operand.hbm [shape: f32[64,256], index: 7, kind: input, shape index: {}]   ;;  %s3689_s8 = inlined_call_operand.vmem [shape: f32[1,256], index: 8, kind: input, shape index: {}]   ;;  %s3690_s9 = inlined_call_operand.hbm [shape: bf16[64,256], index: 9, kind: input, shape index: {}]   ;;  %s3691_s10 = inlined_call_operand.hbm [shape: f32[64,64], index: 10, kind: input, shape index: {}]   ;;  %s3692_s11 = inlined_call_operand.vmem [shape: f32[1,64], index: 11, kind: input, shape index: {}]   ;;  %s3693_s12 = inlined_call_operand.hbm [shape: f32[64,64], index: 12, kind: input, shape index: {}]   ;;  %s3694_s13 = inlined_call_operand.hbm [shape: f32[1,64], index: 13, kind: input, shape index: {}]   ;;  %s3695_s14 = inlined_call_operand.hbm [shape: f32[64,128], index: 14, kind: input, shape index: {}]   ;;  %s3696_s15 = inlined_call_operand.hbm [shape: f32[1,128], index: 15, kind: input, shape index: {}]   ;;  %s3697_s16 = inlined_call_operand.vmem [shape: f32[16,128], index: 16, kind: output, shape index: {}]  }
   0x1   :  { %3700 = sst [smem:[#allocation24_spill]] %s3681_s0 }
   0x2   :  { %3701 = sst [smem:[#allocation25_spill]] %s3697_s16 }
   0x3   :  { %21 = vsyncpa [#allocation3], 0 }
   0x4   :  { %22 = vsyncpa [#allocation5], 0 }
   0x5   :  { %23 = vsyncpa [#allocation8], 0 }
   0x6   :  { %24 = vsyncpa [#allocation11], 0 }
   0x7   :  { %25 = vsyncpa [#allocation14], 0 }
   0x8   :  { %26 = vsyncpa [#allocation17], 0  ;;  %s2861_s21 = smov [#allocation4]   ;;  %s2629_s25 = scalar_lea.hbm %s3686_s5, 1024 }
   0x9   :  { %s52_s22 = sshll.u32 %s2861_s21, 4  ;;  %p2630_p0 = scmp.ne.s32.totalorder %s3686_s5, %s2629_s25  ;;  %s53_s22 = int_to_ptr.vmem [resolvable:$true] %s52_s22 }
   0xa   :  { %p2633_p1 = scmp.lt.u32.totalorder %s2629_s25, %s3686_s5 }
   0xc   :  { %p2635_p2 = pnand %p2633_p1, %p2630_p0 }
   0xe   :  { %2638 = shalt.err (!%p2635_p2)
}
   0xf   :  { %s2639_s30 = scalar_lea.vmem %s53_s22, 1024  ;;  %p2644_p4 = scmp.lt.s32.totalorder %s53_s22, %s53_s22 }
  0x10   :  { %p2640_p3 = scmp.ne.s32.totalorder %s53_s22, %s2639_s30  ;;  %p2645_p5 = scmp.lt.s32.totalorder %s2639_s30, %s2639_s30 }
  0x12   :  { %p2646_p6 = por %p2645_p5, %p2644_p4 }
  0x14   :  { %p2647_p7 = pnand %p2646_p6, %p2640_p3 }
  0x16   :  { %2650 = shalt.err (!%p2647_p7)
}
  0x17   :  { %s2862_s0 = smov 128   ;;  %s2863_s17 = smov 8  }
  0x18   :  { %58 = dma.hbm_to_vmem [thread:$0]  %s3686_s5, 1024, %s53_s22, [#allocation5], %s2862_s0, %s2862_s0, %s2863_s17  }
  0x19   :  { %s2864_s20 = smov [#allocation7]   ;;  %s2865_s23 = smov [#allocation10]  }
  0x1a   :  { %s76_s21 = sshll.u32 %s2864_s20, 4  ;;  %s102_s24 = sshll.u32 %s2865_s23, 4  ;;  %s77_s21 = int_to_ptr.vmem [resolvable:$true] %s76_s21  ;;  %s103_s24 = int_to_ptr.vmem [resolvable:$true] %s102_s24 }
  0x1b   :  { %s2651_s27 = scalar_lea.hbm %s3688_s7, 2048 }
  0x1c   :  { %p2652_p8 = scmp.ne.s32.totalorder %s3688_s7, %s2651_s27  ;;  %p2655_p9 = scmp.lt.u32.totalorder %s2651_s27, %s3688_s7 }
  0x1e   :  { %p2657_p10 = pnand %p2655_p9, %p2652_p8 }
  0x20   :  { %2660 = shalt.err (!%p2657_p10)
}
  0x21   :  { %s2661_s5 = scalar_lea.vmem %s77_s21, 2048  ;;  %p2666_p12 = scmp.lt.s32.totalorder %s77_s21, %s77_s21 }
  0x22   :  { %p2662_p11 = scmp.ne.s32.totalorder %s77_s21, %s2661_s5  ;;  %p2667_p13 = scmp.lt.s32.totalorder %s2661_s5, %s2661_s5 }
  0x24   :  { %p2668_p0 = por %p2667_p13, %p2666_p12 }
  0x26   :  { %p2669_p1 = pnand %p2668_p0, %p2662_p11 }
  0x28   :  { %2672 = shalt.err (!%p2669_p1)
}
  0x29   :  { %s2866_s22 = smov 256   ;;  %s2867_s18 = smov 16  }
  0x2a   :  { %82 = dma.hbm_to_vmem [thread:$0]  %s3688_s7, 2048, %s77_s21, [#allocation8], %s2866_s22, %s2866_s22, %s2867_s18  }
  0x2b   :  { %s2673_s25 = scalar_lea.hbm %s3691_s10, 1024 }
  0x2c   :  { %p2674_p2 = scmp.ne.s32.totalorder %s3691_s10, %s2673_s25  ;;  %p2677_p3 = scmp.lt.u32.totalorder %s2673_s25, %s3691_s10 }
  0x2e   :  { %p2679_p4 = pnand %p2677_p3, %p2674_p2 }
  0x30   :  { %2682 = shalt.err (!%p2679_p4)
}
  0x31   :  { %s2683_s30 = scalar_lea.vmem %s103_s24, 1024  ;;  %p2688_p6 = scmp.lt.s32.totalorder %s103_s24, %s103_s24 }
  0x32   :  { %p2684_p5 = scmp.ne.s32.totalorder %s103_s24, %s2683_s30  ;;  %p2689_p7 = scmp.lt.s32.totalorder %s2683_s30, %s2683_s30 }
  0x34   :  { %p2690_p8 = por %p2689_p7, %p2688_p6 }
  0x36   :  { %p2691_p9 = pnand %p2690_p8, %p2684_p5 }
  0x38   :  { %2694 = shalt.err (!%p2691_p9)
}
  0x39   :  { %108 = dma.hbm_to_vmem [thread:$0]  %s3691_s10, 1024, %s103_s24, [#allocation11], %s2862_s0, %s2862_s0, %s2863_s17  }
  0x3a   :  { %s2868_s5 = smov [#allocation13]   ;;  %s2869_s20 = smov [#allocation2]  }
  0x3b   :  { %s129_s19 = sshll.u32 %s2868_s5, 4  ;;  %s38_s16 = sshll.u32 %s2869_s20, 4  ;;  %s130_s19 = int_to_ptr.vmem [resolvable:$true] %s129_s19  ;;  %s39_s16 = int_to_ptr.vmem [resolvable:$true] %s38_s16 }
  0x3c   :  { %s2695_s26 = scalar_lea.hbm %s3694_s13, 16 }
  0x3d   :  { %p2696_p10 = scmp.ne.s32.totalorder %s3694_s13, %s2695_s26  ;;  %p2699_p11 = scmp.lt.u32.totalorder %s2695_s26, %s3694_s13 }
  0x3f   :  { %p2701_p12 = pnand %p2699_p11, %p2696_p10 }
  0x41   :  { %2704 = shalt.err (!%p2701_p12)
}
  0x42   :  { %s2705_s10 = scalar_lea.vmem %s130_s19, 16  ;;  %s2709_s24 = scalar_lea.vmem %s130_s19, 32 }
  0x43   :  { %p2706_p13 = scmp.ne.s32.totalorder %s130_s19, %s2705_s10  ;;  %p2710_p0 = scmp.lt.s32.totalorder %s130_s19, %s130_s19 }
  0x44   :  { %p2711_p1 = scmp.lt.s32.totalorder %s2709_s24, %s2705_s10 }
  0x46   :  { %p2712_p2 = por %p2711_p1, %p2710_p0 }
  0x48   :  { %p2713_p3 = pnand %p2712_p2, %p2706_p13 }
  0x4a   :  { %2716 = shalt.err (!%p2713_p3)
}
  0x4b   :  { %132 = dma.hbm_to_vmem [thread:$0]  %s3694_s13, 16, %s130_s19, [#allocation14]  }
  0x4c   :  { %s2717_s23 = scalar_lea.hbm %s3684_s3, 2048 }
  0x4d   :  { %p2718_p4 = scmp.ne.s32.totalorder %s3684_s3, %s2717_s23  ;;  %p2721_p5 = scmp.lt.u32.totalorder %s2717_s23, %s3684_s3 }
  0x4f   :  { %p2723_p6 = pnand %p2721_p5, %p2718_p4 }
  0x51   :  { %2726 = shalt.err (!%p2723_p6)
}
  0x52   :  { %s2727_s29 = scalar_lea.vmem %s39_s16, 2048  ;;  %p2732_p8 = scmp.lt.s32.totalorder %s39_s16, %s39_s16 }
  0x53   :  { %p2728_p7 = scmp.ne.s32.totalorder %s39_s16, %s2727_s29  ;;  %p2733_p9 = scmp.lt.s32.totalorder %s2727_s29, %s2727_s29 }
  0x55   :  { %p2734_p10 = por %p2733_p9, %p2732_p8 }
  0x57   :  { %p2735_p11 = pnand %p2734_p10, %p2728_p7 }
  0x59   :  { %2738 = shalt.err (!%p2735_p11)
}
  0x5a   :  { %44 = dma.hbm_to_vmem [thread:$0]  %s3684_s3, 2048, %s39_s16, [#allocation3], %s2866_s22, %s2866_s22, %s2867_s18  }
  0x5b   :  { %s2870_s30 = smov [#allocation6]   ;;  %s2871_s24 = smov [#allocation9]  }
  0x5c   :  { %s64_s10 = sshll.u32 %s2870_s30, 4  ;;  %s90_s7 = sshll.u32 %s2871_s24, 4  ;;  %s65_s10 = int_to_ptr.vmem [resolvable:$true] %s64_s10  ;;  %s91_s7 = int_to_ptr.vmem [resolvable:$true] %s90_s7 }
  0x5d   :  { %s2739_s20 = scalar_lea.hbm %s3687_s6, 2048 }
  0x5e   :  { %p2740_p12 = scmp.ne.s32.totalorder %s3687_s6, %s2739_s20  ;;  %p2743_p13 = scmp.lt.u32.totalorder %s2739_s20, %s3687_s6 }
  0x60   :  { %p2745_p0 = pnand %p2743_p13, %p2740_p12 }
  0x62   :  { %2748 = shalt.err (!%p2745_p0)
}
  0x63   :  { %s2749_s3 = scalar_lea.vmem %s65_s10, 2048  ;;  %p2754_p2 = scmp.lt.s32.totalorder %s65_s10, %s65_s10 }
  0x64   :  { %p2750_p1 = scmp.ne.s32.totalorder %s65_s10, %s2749_s3  ;;  %p2755_p3 = scmp.lt.s32.totalorder %s2749_s3, %s2749_s3 }
  0x66   :  { %p2756_p4 = por %p2755_p3, %p2754_p2 }
  0x68   :  { %p2757_p5 = pnand %p2756_p4, %p2750_p1 }
  0x6a   :  { %2760 = shalt.err (!%p2757_p5)
}
  0x6b   :  { %70 = dma.hbm_to_vmem [thread:$0]  %s3687_s6, 2048, %s65_s10, [#allocation5], %s2866_s22, %s2866_s22, %s2867_s18  }
  0x6c   :  { %s2761_s19 = scalar_lea.hbm %s3690_s9, 1024 }
  0x6d   :  { %p2762_p6 = scmp.ne.s32.totalorder %s3690_s9, %s2761_s19  ;;  %p2765_p7 = scmp.lt.u32.totalorder %s2761_s19, %s3690_s9 }
  0x6f   :  { %p2767_p8 = pnand %p2765_p7, %p2762_p6 }
  0x71   :  { %2770 = shalt.err (!%p2767_p8)
}
  0x72   :  { %s2771_s20 = scalar_lea.vmem %s91_s7, 1024  ;;  %p2776_p10 = scmp.lt.s32.totalorder %s91_s7, %s91_s7 }
  0x73   :  { %p2772_p9 = scmp.ne.s32.totalorder %s91_s7, %s2771_s20  ;;  %p2777_p11 = scmp.lt.s32.totalorder %s2771_s20, %s2771_s20 }
  0x75   :  { %p2778_p12 = por %p2777_p11, %p2776_p10 }
  0x77   :  { %p2779_p13 = pnand %p2778_p12, %p2772_p9 }
  0x79   :  { %2782 = shalt.err (!%p2779_p13)
}
  0x7a   :  { %96 = dma.hbm_to_vmem [thread:$0]  %s3690_s9, 1024, %s91_s7, [#allocation8], %s2862_s0, %s2862_s0, %s2863_s17  }
  0x7b   :  { %s2872_s18 = smov [#allocation12]   ;;  %s2873_s23 = smov [#allocation15]  }
  0x7c   :  { %s116_s10 = sshll.u32 %s2872_s18, 4  ;;  %s138_s25 = sshll.u32 %s2873_s23, 4  ;;  %s117_s10 = int_to_ptr.vmem [resolvable:$true] %s116_s10  ;;  %s139_s25 = int_to_ptr.vmem [resolvable:$true] %s138_s25 }
  0x7d   :  { %s2783_s3 = scalar_lea.hbm %s3693_s12, 1024 }
  0x7e   :  { %p2784_p0 = scmp.ne.s32.totalorder %s3693_s12, %s2783_s3  ;;  %p2787_p1 = scmp.lt.u32.totalorder %s2783_s3, %s3693_s12 }
  0x80   :  { %p2789_p2 = pnand %p2787_p1, %p2784_p0 }
  0x82   :  { %2792 = shalt.err (!%p2789_p2)
}
  0x83   :  { %s2793_s9 = scalar_lea.vmem %s117_s10, 1024  ;;  %p2798_p4 = scmp.lt.s32.totalorder %s117_s10, %s117_s10 }
  0x84   :  { %p2794_p3 = scmp.ne.s32.totalorder %s117_s10, %s2793_s9  ;;  %p2799_p5 = scmp.lt.s32.totalorder %s2793_s9, %s2793_s9 }
  0x86   :  { %p2800_p6 = por %p2799_p5, %p2798_p4 }
  0x88   :  { %p2801_p7 = pnand %p2800_p6, %p2794_p3 }
  0x8a   :  { %2804 = shalt.err (!%p2801_p7)
}
  0x8b   :  { %122 = dma.hbm_to_vmem [thread:$0]  %s3693_s12, 1024, %s117_s10, [#allocation11], %s2862_s0, %s2862_s0, %s2863_s17  }
  0x8c   :  { %s2805_s21 = scalar_lea.hbm %s3695_s14, 1024 }
  0x8d   :  { %p2806_p8 = scmp.ne.s32.totalorder %s3695_s14, %s2805_s21  ;;  %p2809_p9 = scmp.lt.u32.totalorder %s2805_s21, %s3695_s14 }
  0x8f   :  { %p2811_p10 = pnand %p2809_p9, %p2806_p8 }
  0x91   :  { %2814 = shalt.err (!%p2811_p10)
}
  0x92   :  { %s2815_s18 = scalar_lea.vmem %s139_s25, 1024  ;;  %p2820_p12 = scmp.lt.s32.totalorder %s139_s25, %s139_s25 }
  0x93   :  { %p2816_p11 = scmp.ne.s32.totalorder %s139_s25, %s2815_s18  ;;  %p2821_p13 = scmp.lt.s32.totalorder %s2815_s18, %s2815_s18 }
  0x95   :  { %p2822_p0 = por %p2821_p13, %p2820_p12 }
  0x97   :  { %p2823_p1 = pnand %p2822_p0, %p2816_p11 }
  0x99   :  { %2826 = shalt.err (!%p2823_p1)
}
  0x9a   :  { %144 = dma.hbm_to_vmem [thread:$0]  %s3695_s14, 1024, %s139_s25, [#allocation14], %s2862_s0, %s2862_s0, %s2863_s17  }
  0x9b   :  { %s2874_s23 = smov [#allocation16]   ;;  %s2827_s16 = scalar_lea.hbm %s3696_s15, 16 }
  0x9c   :  { %s151_s26 = sshll.u32 %s2874_s23, 4  ;;  %p2828_p2 = scmp.ne.s32.totalorder %s3696_s15, %s2827_s16  ;;  %s152_s26 = int_to_ptr.vmem [resolvable:$true] %s151_s26 }
  0x9d   :  { %p2831_p3 = scmp.lt.u32.totalorder %s2827_s16, %s3696_s15 }
  0x9f   :  { %p2833_p4 = pnand %p2831_p3, %p2828_p2 }
  0xa1   :  { %2836 = shalt.err (!%p2833_p4)
}
  0xa2   :  { %s2837_s7 = scalar_lea.vmem %s152_s26, 16  ;;  %s2841_s14 = scalar_lea.vmem %s152_s26, 32 }
  0xa3   :  { %p2838_p5 = scmp.ne.s32.totalorder %s152_s26, %s2837_s7  ;;  %p2842_p6 = scmp.lt.s32.totalorder %s152_s26, %s152_s26 }
  0xa4   :  { %p2843_p7 = scmp.lt.s32.totalorder %s2841_s14, %s2837_s7 }
  0xa6   :  { %p2844_p8 = por %p2843_p7, %p2842_p6 }
  0xa8   :  { %p2845_p9 = pnand %p2844_p8, %p2838_p5 }
  0xaa   :  { %2848 = shalt.err (!%p2845_p9)
}
  0xab   :  { %154 = dma.hbm_to_vmem [thread:$0]  %s3696_s15, 16, %s152_s26, [#allocation17]  }
  0xac   :  { %2849 = dma.done.wait [#allocation3], 2048  }
  0xad   :  { %2850 = vsyncadd [#allocation3], 4294965248 }
  0xae   :  { %2851 = dma.done.wait [#allocation5], 3072  }
  0xaf   :  { %2852 = vsyncadd [#allocation5], 4294964224 }
  0xb0   :  { %2853 = dma.done.wait [#allocation8], 3072  }
  0xb1   :  { %2854 = vsyncadd [#allocation8], 4294964224 }
  0xb2   :  { %2855 = dma.done.wait [#allocation11], 2048  }
  0xb3   :  { %2856 = vsyncadd [#allocation11], 4294965248 }
  0xb4   :  { %2857 = dma.done.wait [#allocation14], 1040  }
  0xb5   :  { %2858 = vsyncadd [#allocation14], 4294966256 }
  0xb6   :  { %2859 = dma.done.wait [#allocation17], 16  }
  0xb7   :  { %2860 = vsyncadd [#allocation17], 4294967280  ;;  %v2875_v0 = vmov 0.0   ;;  %v2876_v1 = vmov 0   ;;  %v221_v2 = vld [vmem:[#allocation2 + $0x8] sm:$0xff]  ;;  %v223_v3 = vld [vmem:[#allocation2 + $0x18] sm:$0xff]  ;;  %v186_v62 = vlaneseq }
  0xb8   :  { %307 = vmatprep.mubr.f32.mxu0 %v2875_v0  ;;  %502 = vmatprep.mubr.bf16.mxu1 %v2876_v1  ;;  %v220_v4 = vld [vmem:[#allocation2] sm:$0xff]  ;;  %v2371_v5 = vpack.c.bf16 %v223_v3, %v221_v2  ;;  %v222_v6 = vld [vmem:[#allocation2 + $0x10] sm:$0xff]  ;;  %v225_v7 = vld [vmem:[#allocation2 + $0x28] sm:$0xff]  ;;  %vm236_vm0 = vcmask 523264   ;;  %s3702_s12 = sld [smem:[#allocation24_spill]]  ;;  %vm1053_vm3 = vcmask 1041408  }
  0xb9   :  { %v227_v8 = vld [vmem:[#allocation2 + $0x38] sm:$0xff]  ;;  %v2373_v9 = vpack.c.bf16 %v222_v6, %v220_v4  ;;  %v224_v11 = vld [vmem:[#allocation2 + $0x20] sm:$0xff]  ;;  %v226_v12 = vld [vmem:[#allocation2 + $0x30] sm:$0xff]  ;;  %v3222_v63 = vshrl.u32 %v186_v62, 7  ;;  %vm1055_vm4 = vcmask 1043456   ;;  %vm1057_vm5 = vcmask 1045504  }
  0xba   :  { %v2375_v10 = vpack.c.bf16 %v227_v8, %v225_v7  ;;  %v229_v13 = vld [vmem:[#allocation2 + $0x48] sm:$0xff]  ;;  %2372 = vmatprep.subr.bf16.mxu0 %v2371_v5  ;;  %v231_v14 = vld [vmem:[#allocation2 + $0x58] sm:$0xff]  ;;  %v2377_v15 = vpack.c.bf16 %v226_v12, %v224_v11  ;;  %v228_v16 = vld [vmem:[#allocation2 + $0x40] sm:$0xff]  ;;  %s3703_s29 = sld [smem:[#allocation25_spill]] }
  0xbb   :  { %2374 = vmatpush1.bf16.msra.mxu0 %v2373_v9  ;;  %v2379_v17 = vpack.c.bf16 %v231_v14, %v229_v13  ;;  %v230_v18 = vld [vmem:[#allocation2 + $0x50] sm:$0xff]  ;;  %v233_v19 = vld [vmem:[#allocation2 + $0x68] sm:$0xff]  ;;  %v235_v20 = vld [vmem:[#allocation2 + $0x78] sm:$0xff]  ;;  %v407_v5 = vsub.s32 0, %v3222_v63  ;;  %v411_v8 = vsub.s32 1, %v3222_v63 }
  0xbc   :  { %2376 = vmatprep.subr.bf16.mxu0 %v2375_v10  ;;  %v3110_v21 = vld [vmem:[#allocation4 + $0x4] ss:$8 sps:$4 sm:$0xff]   ;;  %v3112_v22 = vld [vmem:[#allocation4] ss:$8 sps:$4 sm:$0xff]   ;;  %v2381_v23 = vpack.c.bf16 %v230_v18, %v228_v16  ;;  %v2383_v24 = vpack.c.bf16 %v235_v20, %v233_v19  ;;  %v234_v26 = vld [vmem:[#allocation2 + $0x70] sm:$0xff] }
  0xbd   :  { %470 = vmatprep.subr.bf16.mxu1 %v3110_v21  ;;  %v232_v25 = vld [vmem:[#allocation2 + $0x60] sm:$0xff]  ;;  %v3116_v27 = vld [vmem:[#allocation4 + $0x14] ss:$8 sps:$4 sm:$0xff]   ;;  %v205_v28 = vld [vmem:[%s3683_s2 + $0x8] sm:$0xff] }
  0xbe   :  { %471 = vmatpush1.bf16.msra.mxu1 %v3112_v22  ;;  %v207_v29 = vld [vmem:[%s3683_s2 + $0x18] sm:$0xff]  ;;  %v3127_v31 = vld [vmem:[#allocation4 + $0x24] ss:$8 sps:$4 sm:$0xff]   ;;  %v2385_v32 = vpack.c.bf16 %v234_v26, %v232_v25  ;;  %v206_v34 = vld [vmem:[%s3683_s2 + $0x10] sm:$0xff]  ;;  %v2877_v25 = vmov 0.5  }
  0xbf   :  { %2378 = vmatpush1.bf16.msra.mxu0 %v2377_v15  ;;  %v3124_v30 = vld [vmem:[#allocation4 + $0x10] ss:$8 sps:$4 sm:$0xff]   ;;  %472 = vmatprep.subr.bf16.mxu1 %v3116_v27  ;;  %v204_v33 = vld [vmem:[%s3683_s2] sm:$0xff]  ;;  %v2387_v35 = vpack.c.bf16 %v207_v29, %v205_v28  ;;  %v209_v36 = vld [vmem:[%s3683_s2 + $0x28] sm:$0xff]  ;;  %v3237_v15 = vand.u32 127, %v186_v62 }
  0xc0   :  { %2380 = vmatprep.subr.bf16.mxu0 %v2379_v17  ;;  %v3139_v37 = vld [vmem:[#allocation4 + $0x20] ss:$8 sps:$4 sm:$0xff]   ;;  %v211_v38 = vld [vmem:[%s3683_s2 + $0x38] sm:$0xff]  ;;  %v2389_v42 = vpack.c.bf16 %v206_v34, %v204_v33  ;;  %v210_v43 = vld [vmem:[%s3683_s2 + $0x30] sm:$0xff] }
  0xc1   :  { %v3145_v39 = vld [vmem:[#allocation4 + $0x34] ss:$8 sps:$4 sm:$0xff]   ;;  %v202_v40 = vld [vmem:[%s3682_s1] sm:$0xff]  ;;  %v213_v44 = vld [vmem:[%s3683_s2 + $0x48] sm:$0xff]  ;;  %v2391_v46 = vpack.c.bf16 %v211_v38, %v209_v36  ;;  %vm199_vm2 = vcmp.lt.s32.totalorder %v3237_v15, 32 }
  0xc2   :  { %473 = vmatpush1.bf16.msra.mxu1 %v3124_v30  ;;  %v208_v41 = vld [vmem:[%s3683_s2 + $0x20] sm:$0xff]  ;;  %v215_v45 = vld [vmem:[%s3683_s2 + $0x58] sm:$0xff]  ;;  %v203_v49 = vld [vmem:[%s3682_s1 + $0x8] sm:$0xff] }
  0xc3   :  { %2382 = vmatpush1.bf16.msra.mxu0 %v2381_v23  ;;  %474 = vmatprep.subr.bf16.mxu1 %v3127_v31  ;;  %v3163_v47 = vld [vmem:[#allocation4 + $0x30] ss:$8 sps:$4 sm:$0xff]   ;;  %v2393_v48 = vpack.c.bf16 %v210_v43, %v208_v41  ;;  %v2395_v50 = vpack.c.bf16 %v215_v45, %v213_v44  ;;  %v212_v51 = vld [vmem:[%s3683_s2 + $0x40] sm:$0xff]  ;;  %v217_v53 = vld [vmem:[%s3683_s2 + $0x68] sm:$0xff] }
  0xc4   :  { %2384 = vmatprep.subr.bf16.mxu0 %v2383_v24  ;;  %v214_v52 = vld [vmem:[%s3683_s2 + $0x50] sm:$0xff]  ;;  %v219_v54 = vld [vmem:[%s3683_s2 + $0x78] sm:$0xff]  ;;  %v216_v57 = vld [vmem:[%s3683_s2 + $0x60] sm:$0xff]  ;;  %v188_v24 = vadd.s32 128, %v3237_v15 }
  0xc5   :  { %v2397_v55 = vpack.c.bf16 %v214_v52, %v212_v51  ;;  %v2399_v56 = vpack.c.bf16 %v219_v54, %v217_v53  ;;  %v218_v58 = vld [vmem:[%s3683_s2 + $0x70] sm:$0xff]  ;;  %v200_v60 = vld [vmem:[%s3702_s12] sm:$0xff]  ;;  %v201_v61 = vld [vmem:[%s3702_s12 + $0x8] sm:$0xff] }
  0xc6   :  { %475 = vmatpush1.bf16.msra.mxu1 %v3139_v37  ;;  %v2401_v59 = vpack.c.bf16 %v218_v58, %v216_v57  ;;  %v403_v7 = vld [vmem:[%s3685_s4] sm:$0x3]  ;;  %vm192_vm1 = vcmp.lt.s32.totalorder %v188_v24, 192  ;;  %s2878_s4 = smov 64  }
  0xc7   :  { %2386 = vmatpush1.bf16.msra.mxu0 %v2385_v32  ;;  %476 = vmatprep.subr.bf16.mxu1 %v3145_v39  ;;  %v408_v9 = vrot.slane %v403_v7, %v407_v5  ;;  %v412_v10 = vrot.slane %v403_v7, %v411_v8  ;;  %v3246_v26 = vsel %vm192_vm1, 1.0, %v2877_v25  ;;  %v3248_v32 = vsel %vm192_vm1, 0.0, %v2877_v25 }
  0xc8   :  { %2388 = vmatprep.subr.bf16.mxu0 %v2387_v35 }
  0xca   :  { %2237 = vmatmul.mubr.msk.f32.vlgmr.msra.gmra.mrb[0].mxu0 %vm236_vm0, %v202_v40  ;;  %477 = vmatpush1.bf16.msra.mxu1 %v3163_v47 }
  0xcb   :  { %2390 = vmatpush1.bf16.msra.mxu0 %v2389_v42  ;;  %313 = vmatprep.mubr.f32.mxu0 %v2875_v0 }
  0xcc   :  { %2392 = vmatprep.subr.bf16.mxu0 %v2391_v46  ;;  %539 = vmatprep.subr.bf16.mxu1 %v3110_v21 }
  0xcd   :  { %503 = vmatmul.mubr.bf16.vlgmr.msra.gmra.mrb[0].mxu1 %v2876_v1 }
  0xce   :  { %2238 = vmatmul.mubr.msk.f32.gmra.mrb[2].mxu0 %vm236_vm0, %v203_v49  ;;  %540 = vmatpush1.bf16.msra.mxu1 %v3112_v22 }
  0xcf   :  { %2394 = vmatpush1.bf16.msra.mxu0 %v2393_v48  ;;  %390 = vmatprep.mubr.f32.mxu0 %v2875_v0 }
  0xd0   :  { %2396 = vmatprep.subr.bf16.mxu0 %v2395_v50  ;;  %571 = vmatprep.mubr.bf16.mxu1 %v2876_v1 }
  0xd1   :  { %541 = vmatprep.subr.bf16.mxu1 %v3116_v27 }
  0xd2   :  { %542 = vmatpush1.bf16.msra.mxu1 %v3124_v30 }
  0xd3   :  { %2398 = vmatpush1.bf16.msra.mxu0 %v2397_v55  ;;  %543 = vmatprep.subr.bf16.mxu1 %v3127_v31 }
  0xd4   :  { %2400 = vmatprep.subr.bf16.mxu0 %v2399_v56 }
  0xd6   :  { %544 = vmatpush1.bf16.msra.mxu1 %v3139_v37 }
  0xd7   :  { %2402 = vmatpush1.bf16.msra.mxu0 %v2401_v59  ;;  %545 = vmatprep.subr.bf16.mxu1 %v3145_v39 }
  0xd8   :  { %606 = vmatprep.subr.bf16.mxu0 %v3110_v21 }
  0xda   :  { %2239 = vmatmul.mubr.msk.f32.vlgmr.msra.gmra.mrb[0].mxu0 %vm236_vm0, %v200_v60  ;;  %546 = vmatpush1.bf16.msra.mxu1 %v3163_v47 }
  0xdb   :  { %396 = vmatprep.mubr.f32.mxu0 %v2875_v0  ;;  %607 = vmatpush1.bf16.msra.mxu0 %v3112_v22 }
  0xdc   :  { %608 = vmatprep.subr.bf16.mxu0 %v3116_v27  ;;  %673 = vmatprep.subr.bf16.mxu1 %v3110_v21 }
  0xde   :  { %2240 = vmatmul.mubr.msk.f32.gmra.mrb[2].mxu0 %vm236_vm0, %v201_v61 }
  0xdf   :  { %609 = vmatpush1.bf16.msra.mxu0 %v3124_v30  ;;  %638 = vmatprep.mubr.bf16.mxu0 %v2876_v1 }
  0xe0   :  { %610 = vmatprep.subr.bf16.mxu0 %v3127_v31 }
  0xe3   :  { %611 = vmatpush1.bf16.msra.mxu0 %v3139_v37 }
  0xe4   :  { %612 = vmatprep.subr.bf16.mxu0 %v3145_v39 }
  0xe7   :  { %613 = vmatpush1.bf16.msra.mxu0 %v3163_v47 }
  0xe8   :  { %736 = vmatprep.subr.bf16.mxu0 %v3110_v21 }
 0x1a0   :  { %v504_v2 = vpop.f32.mrb[0].mxu1 }
 0x1a1   :  { %v506_v3 = vpop.f32.mrb[1].mxu1 }
 0x1a2   :  { %v508_v4 = vpop.f32.mrb[2].mxu1 }
 0x1a3   :  { %v509_v6 = vpop.f32.mrb[3].mxu1 }
 0x1ad   :  { %v392_v11 = vpop.f32.mrb[0].mxu0 }
 0x1ae   :  { %v3233_v12 = vadd.f32 %v408_v9, %v392_v11  ;;  %v394_v13 = vpop.f32.mrb[1].mxu0 }
 0x1af   :  { %v3235_v14 = vadd.f32 %v412_v10, %v394_v13 }
 0x1b0   :  { %v505_v16 = vadd.f32 %v504_v2, %v3233_v12  ;;  %v532_v48 = vrot.slane %v3233_v12, 2  ;;  %v599_v11 = vrot.slane %v3233_v12, 4 }
 0x1b1   :  { %v507_v17 = vadd.f32 %v506_v3, %v3235_v14  ;;  %v398_v18 = vpop.f32.mrb[2].mxu0  ;;  %v533_v50 = vrot.slane %v3235_v14, 2 }
 0x1b2   :  { %v3241_v19 = vadd.f32 %v408_v9, %v398_v18  ;;  %v400_v20 = vpop.f32.mrb[3].mxu0  ;;  %2533 = vtanh.f32 %v505_v16  ;;  %v600_v16 = vrot.slane %v3235_v14, 4 }
 0x1b3   :  { %2535 = vtanh.f32 %v507_v17  ;;  %v3243_v23 = vadd.f32 %v412_v10, %v400_v20 }
 0x1bc   :  { %v2534_v28 = vpop.eup %2533 }
 0x1bd   :  { %v2536_v29 = vpop.eup %2535  ;;  %v513_v33 = vmul.f32 0.5, %v2534_v28 }
 0x1be   :  { %v514_v34 = vmul.f32 %v2536_v29, %v3246_v26 }
 0x1bf   :  { %v515_v35 = vadd.f32 0.5, %v513_v33 }
 0x1c0   :  { %v516_v36 = vadd.f32 %v514_v34, %v3248_v32 }
 0x1c1   :  { %v517_v40 = vmul.f32 0.0, %v515_v35 }
 0x1c2   :  { %v518_v38 = vmul.f32 %v516_v36, %v515_v35 }
 0x1c4   :  { %520 = vrot.lane.b32.xlu0 %v518_v38, %s2878_s4 }
 0x236   :  { %v521_v41 = vpop.permute.xlu0 %520 }
 0x237   :  { %v523_v42 = vadd.f32 %v521_v41, %v517_v40 }
 0x239   :  { %2537 = vtanh.f32 %v523_v42 }
 0x243   :  { %v2538_v43 = vpop.eup %2537 }
 0x244   :  { %v3253_v44 = vmul.f32 %v2538_v43, %v516_v36 }
 0x246   :  { %v526_v45 = vpack.c.bf16 %v3253_v44, %v3253_v44 }
 0x248   :  { %528 = vrot.lane.b32.xlu0 %v526_v45, %s2878_s4 }
 0x2ba   :  { %v529_v46 = vpop.permute.xlu0 %528 }
 0x2bb   :  { %2249 = vmatmul.mubr.msk.bf16.vlgmr.msra.gmra.mrb[4].mxu1 %vm236_vm0, %v529_v46 }
 0x2bc   :  { %674 = vmatpush1.bf16.msra.mxu1 %v3112_v22  ;;  %705 = vmatprep.mubr.bf16.mxu1 %v2876_v1 }
 0x2bd   :  { %675 = vmatprep.subr.bf16.mxu1 %v3116_v27 }
 0x2c0   :  { %676 = vmatpush1.bf16.msra.mxu1 %v3124_v30 }
 0x2c1   :  { %677 = vmatprep.subr.bf16.mxu1 %v3127_v31 }
 0x2c4   :  { %678 = vmatpush1.bf16.msra.mxu1 %v3139_v37 }
 0x2c5   :  { %679 = vmatprep.subr.bf16.mxu1 %v3145_v39 }
 0x2c8   :  { %680 = vmatpush1.bf16.msra.mxu1 %v3163_v47 }
 0x2c9   :  { %805 = vmatprep.subr.bf16.mxu1 %v3110_v21 }
 0x38e   :  { %v573_v49 = vpop.f32.mrb[4].mxu1 }
 0x38f   :  { %v574_v51 = vadd.f32 %v573_v49, %v532_v48  ;;  %v575_v52 = vpop.f32.mrb[5].mxu1  ;;  %v666_v49 = vrot.slane %v3233_v12, 6 }
 0x390   :  { %v576_v53 = vadd.f32 %v575_v52, %v533_v50  ;;  %v577_v54 = vpop.f32.mrb[6].mxu1 }
 0x391   :  { %2539 = vtanh.f32 %v574_v51  ;;  %v578_v55 = vpop.f32.mrb[7].mxu1  ;;  %v667_v51 = vrot.slane %v3235_v14, 6 }
 0x392   :  { %2541 = vtanh.f32 %v576_v53 }
 0x39b   :  { %v2540_v56 = vpop.eup %2539 }
 0x39c   :  { %v2542_v57 = vpop.eup %2541  ;;  %v582_v58 = vmul.f32 0.5, %v2540_v56 }
 0x39d   :  { %v583_v59 = vmul.f32 %v2542_v57, %v3246_v26 }
 0x39e   :  { %v584_v60 = vadd.f32 0.5, %v582_v58 }
 0x39f   :  { %v585_v61 = vadd.f32 %v583_v59, %v3248_v32 }
 0x3a0   :  { %v586_v2 = vmul.f32 %v584_v60, %v523_v42 }
 0x3a1   :  { %v587_v62 = vmul.f32 %v585_v61, %v584_v60 }
 0x3a3   :  { %589 = vrot.lane.b32.xlu1 %v587_v62, %s2878_s4 }
 0x415   :  { %v590_v3 = vpop.permute.xlu1 %589 }
 0x416   :  { %v592_v4 = vadd.f32 %v590_v3, %v586_v2 }
 0x418   :  { %2543 = vtanh.f32 %v592_v4 }
 0x422   :  { %v2544_v6 = vpop.eup %2543 }
 0x423   :  { %v3273_v7 = vmul.f32 %v2544_v6, %v585_v61 }
 0x425   :  { %v595_v9 = vpack.c.bf16 %v3273_v7, %v3273_v7 }
 0x427   :  { %597 = vrot.lane.b32.xlu1 %v595_v9, %s2878_s4 }
 0x499   :  { %v598_v10 = vpop.permute.xlu1 %597 }
 0x49a   :  { %2250 = vmatmul.mubr.msk.bf16.vlgmr.msra.gmra.mrb[4].mxu0 %vm236_vm0, %v598_v10 }
 0x49b   :  { %737 = vmatpush1.bf16.msra.mxu0 %v3112_v22  ;;  %768 = vmatprep.mubr.bf16.mxu0 %v2876_v1 }
 0x49c   :  { %738 = vmatprep.subr.bf16.mxu0 %v3116_v27 }
 0x49f   :  { %739 = vmatpush1.bf16.msra.mxu0 %v3124_v30 }
 0x4a0   :  { %740 = vmatprep.subr.bf16.mxu0 %v3127_v31 }
 0x4a3   :  { %741 = vmatpush1.bf16.msra.mxu0 %v3139_v37 }
 0x4a4   :  { %742 = vmatprep.subr.bf16.mxu0 %v3145_v39 }
 0x4a7   :  { %743 = vmatpush1.bf16.msra.mxu0 %v3163_v47 }
 0x4a8   :  { %872 = vmatprep.subr.bf16.mxu0 %v3110_v21 }
 0x56d   :  { %v640_v13 = vpop.f32.mrb[4].mxu0 }
 0x56e   :  { %v641_v17 = vadd.f32 %v640_v13, %v599_v11  ;;  %v642_v18 = vpop.f32.mrb[5].mxu0 }
 0x56f   :  { %v643_v20 = vadd.f32 %v642_v18, %v600_v16  ;;  %v644_v24 = vpop.f32.mrb[6].mxu0 }
 0x570   :  { %2545 = vtanh.f32 %v641_v17  ;;  %v645_v25 = vpop.f32.mrb[7].mxu0 }
 0x571   :  { %2547 = vtanh.f32 %v643_v20 }
 0x57a   :  { %v2546_v28 = vpop.eup %2545 }
 0x57b   :  { %v2548_v29 = vpop.eup %2547  ;;  %v649_v33 = vmul.f32 0.5, %v2546_v28 }
 0x57c   :  { %v650_v34 = vmul.f32 %v2548_v29, %v3246_v26 }
 0x57d   :  { %v651_v35 = vadd.f32 0.5, %v649_v33 }
 0x57e   :  { %v652_v36 = vadd.f32 %v650_v34, %v3248_v32 }
 0x57f   :  { %v653_v40 = vmul.f32 %v651_v35, %v592_v4 }
 0x580   :  { %v654_v38 = vmul.f32 %v652_v36, %v651_v35 }
 0x582   :  { %656 = vrot.lane.b32.xlu0 %v654_v38, %s2878_s4 }
 0x5f4   :  { %v657_v41 = vpop.permute.xlu0 %656 }
 0x5f5   :  { %v659_v42 = vadd.f32 %v657_v41, %v653_v40 }
 0x5f7   :  { %2549 = vtanh.f32 %v659_v42 }
 0x601   :  { %v2550_v43 = vpop.eup %2549 }
 0x602   :  { %v3293_v45 = vmul.f32 %v2550_v43, %v652_v36 }
 0x604   :  { %v662_v46 = vpack.c.bf16 %v3293_v45, %v3293_v45 }
 0x606   :  { %664 = vrot.lane.b32.xlu1 %v662_v46, %s2878_s4  ;;  %v798_v46 = vrot.slane %v3241_v19, 2 }
 0x678   :  { %v665_v48 = vpop.permute.xlu1 %664 }
 0x679   :  { %2251 = vmatmul.mubr.msk.bf16.vlgmr.msra.gmra.mrb[8].mxu1 %vm236_vm0, %v665_v48 }
 0x67a   :  { %806 = vmatpush1.bf16.msra.mxu1 %v3112_v22  ;;  %837 = vmatprep.mubr.bf16.mxu1 %v2876_v1 }
 0x67b   :  { %807 = vmatprep.subr.bf16.mxu1 %v3116_v27 }
 0x67e   :  { %808 = vmatpush1.bf16.msra.mxu1 %v3124_v30 }
 0x67f   :  { %809 = vmatprep.subr.bf16.mxu1 %v3127_v31 }
 0x682   :  { %810 = vmatpush1.bf16.msra.mxu1 %v3139_v37 }
 0x683   :  { %811 = vmatprep.subr.bf16.mxu1 %v3145_v39 }
 0x686   :  { %812 = vmatpush1.bf16.msra.mxu1 %v3163_v47 }
 0x687   :  { %939 = vmatprep.subr.bf16.mxu1 %v3110_v21 }
 0x74c   :  { %v707_v50 = vpop.f32.mrb[8].mxu1 }
 0x74d   :  { %v708_v52 = vadd.f32 %v707_v50, %v666_v49  ;;  %v709_v53 = vpop.f32.mrb[9].mxu1  ;;  %v799_v49 = vrot.slane %v3243_v23, 2 }
 0x74e   :  { %v710_v54 = vadd.f32 %v709_v53, %v667_v51  ;;  %v711_v55 = vpop.f32.mrb[10].mxu1 }
 0x74f   :  { %2551 = vtanh.f32 %v708_v52  ;;  %v712_v56 = vpop.f32.mrb[11].mxu1 }
 0x750   :  { %2553 = vtanh.f32 %v710_v54 }
 0x759   :  { %v2552_v57 = vpop.eup %2551 }
 0x75a   :  { %v2554_v58 = vpop.eup %2553  ;;  %v716_v59 = vmul.f32 0.5, %v2552_v57 }
 0x75b   :  { %v717_v60 = vmul.f32 %v2554_v58, %v3246_v26 }
 0x75c   :  { %v718_v61 = vadd.f32 0.5, %v716_v59 }
 0x75d   :  { %v719_v21 = vadd.f32 %v717_v60, %v3248_v32 }
 0x75e   :  { %v720_v12 = vmul.f32 %v718_v61, %v659_v42 }
 0x75f   :  { %v721_v62 = vmul.f32 %v719_v21, %v718_v61 }
 0x761   :  { %723 = vrot.lane.b32.xlu0 %v721_v62, %s2878_s4 }
 0x7d3   :  { %v724_v14 = vpop.permute.xlu0 %723 }
 0x7d4   :  { %v726_v2 = vadd.f32 %v724_v14, %v720_v12  ;;  %v866_v12 = vrot.slane %v3243_v23, 4 }
 0x7d6   :  { %2555 = vtanh.f32 %v726_v2 }
 0x7e0   :  { %v2556_v3 = vpop.eup %2555 }
 0x7e1   :  { %v3313_v4 = vmul.f32 %v2556_v3, %v719_v21  ;;  %v865_v21 = vrot.slane %v3241_v19, 4 }
 0x7e3   :  { %v729_v6 = vpack.c.bf16 %v3313_v4, %v3313_v4 }
 0x7e5   :  { %731 = vrot.lane.b32.xlu1 %v729_v6, %s2878_s4 }
 0x857   :  { %v732_v9 = vpop.permute.xlu1 %731 }
 0x858   :  { %2252 = vmatmul.mubr.msk.bf16.vlgmr.msra.gmra.mrb[8].mxu0 %vm236_vm0, %v732_v9 }
 0x859   :  { %873 = vmatpush1.bf16.msra.mxu0 %v3112_v22  ;;  %904 = vmatprep.mubr.bf16.mxu0 %v2876_v1 }
 0x85a   :  { %874 = vmatprep.subr.bf16.mxu0 %v3116_v27 }
 0x85d   :  { %875 = vmatpush1.bf16.msra.mxu0 %v3124_v30 }
 0x85e   :  { %876 = vmatprep.subr.bf16.mxu0 %v3127_v31 }
 0x861   :  { %877 = vmatpush1.bf16.msra.mxu0 %v3139_v37 }
 0x862   :  { %878 = vmatprep.subr.bf16.mxu0 %v3145_v39 }
 0x865   :  { %879 = vmatpush1.bf16.msra.mxu0 %v3163_v47 }
 0x92b   :  { %v770_v10 = vpop.f32.mrb[8].mxu0 }
 0x92c   :  { %v771_v11 = vadd.f32 %v770_v10, %v3241_v19  ;;  %v772_v13 = vpop.f32.mrb[9].mxu0 }
 0x92d   :  { %v773_v16 = vadd.f32 %v772_v13, %v3243_v23  ;;  %v774_v17 = vpop.f32.mrb[10].mxu0 }
 0x92e   :  { %2557 = vtanh.f32 %v771_v11  ;;  %v775_v18 = vpop.f32.mrb[11].mxu0 }
 0x92f   :  { %2559 = vtanh.f32 %v773_v16 }
 0x938   :  { %v2558_v20 = vpop.eup %2557 }
 0x939   :  { %v2560_v24 = vpop.eup %2559  ;;  %v779_v25 = vmul.f32 0.5, %v2558_v20 }
 0x93a   :  { %v780_v28 = vmul.f32 %v2560_v24, %v3246_v26 }
 0x93b   :  { %v781_v29 = vadd.f32 0.5, %v779_v25 }
 0x93c   :  { %v782_v33 = vadd.f32 %v780_v28, %v3248_v32 }
 0x93d   :  { %v783_v35 = vmul.f32 %v781_v29, %v726_v2 }
 0x93e   :  { %v784_v34 = vmul.f32 %v782_v33, %v781_v29 }
 0x940   :  { %786 = vrot.lane.b32.xlu0 %v784_v34, %s2878_s4 }
 0x9b2   :  { %v787_v36 = vpop.permute.xlu0 %786 }
 0x9b3   :  { %v789_v38 = vadd.f32 %v787_v36, %v783_v35  ;;  %v932_v36 = vrot.slane %v3241_v19, 6  ;;  %v1099_v19 = vld [vmem:[#allocation7 + $0x8] sm:$0xff] }
 0x9b5   :  { %2561 = vtanh.f32 %v789_v38 }
 0x9bf   :  { %v2562_v40 = vpop.eup %2561 }
 0x9c0   :  { %v3332_v41 = vmul.f32 %v2562_v40, %v782_v33  ;;  %v933_v40 = vrot.slane %v3243_v23, 6  ;;  %v1101_v23 = vld [vmem:[#allocation7 + $0x18] sm:$0xff] }
 0x9c2   :  { %v792_v42 = vpack.c.bf16 %v3332_v41, %v3332_v41 }
 0x9c4   :  { %794 = vrot.lane.b32.xlu1 %v792_v42, %s2878_s4 }
 0xa36   :  { %v795_v43 = vpop.permute.xlu1 %794 }
 0xa37   :  { %2253 = vmatmul.mubr.msk.bf16.vlgmr.msra.gmra.mrb[12].mxu1 %vm236_vm0, %v795_v43 }
 0xa38   :  { %940 = vmatpush1.bf16.msra.mxu1 %v3112_v22  ;;  %971 = vmatprep.mubr.bf16.mxu1 %v2876_v1 }
 0xa39   :  { %941 = vmatprep.subr.bf16.mxu1 %v3116_v27 }
 0xa3c   :  { %942 = vmatpush1.bf16.msra.mxu1 %v3124_v30 }
 0xa3d   :  { %943 = vmatprep.subr.bf16.mxu1 %v3127_v31 }
 0xa40   :  { %944 = vmatpush1.bf16.msra.mxu1 %v3139_v37 }
 0xa41   :  { %945 = vmatprep.subr.bf16.mxu1 %v3145_v39 }
 0xa44   :  { %946 = vmatpush1.bf16.msra.mxu1 %v3163_v47 }
 0xb0a   :  { %v839_v48 = vpop.f32.mrb[12].mxu1 }
 0xb0b   :  { %v840_v22 = vadd.f32 %v839_v48, %v798_v46  ;;  %v841_v50 = vpop.f32.mrb[13].mxu1 }
 0xb0c   :  { %v842_v51 = vadd.f32 %v841_v50, %v799_v49  ;;  %v843_v52 = vpop.f32.mrb[14].mxu1 }
 0xb0d   :  { %2563 = vtanh.f32 %v840_v22  ;;  %v844_v27 = vpop.f32.mrb[15].mxu1  ;;  %v1098_v52 = vld [vmem:[#allocation7] sm:$0xff] }
 0xb0e   :  { %2565 = vtanh.f32 %v842_v51  ;;  %v2403_v27 = vpack.c.bf16 %v1101_v23, %v1099_v19 }
 0xb10   :  { %2404 = vmatprep.subr.bf16.mxu0 %v2403_v27  ;;  %v1089_v27 = vld [vmem:[#allocation6 + $0x38] sm:$0xff] }
 0xb17   :  { %v2564_v30 = vpop.eup %2563 }
 0xb18   :  { %v2566_v31 = vpop.eup %2565  ;;  %v848_v53 = vmul.f32 0.5, %v2564_v30  ;;  %v1100_v30 = vld [vmem:[#allocation7 + $0x10] sm:$0xff] }
 0xb19   :  { %v849_v37 = vmul.f32 %v2566_v31, %v3246_v26  ;;  %v1103_v31 = vld [vmem:[#allocation7 + $0x28] sm:$0xff] }
 0xb1a   :  { %v850_v39 = vadd.f32 0.5, %v848_v53  ;;  %v1105_v53 = vld [vmem:[#allocation7 + $0x38] sm:$0xff] }
 0xb1b   :  { %v851_v47 = vadd.f32 %v849_v37, %v3248_v32  ;;  %v2405_v37 = vpack.c.bf16 %v1100_v30, %v1098_v52  ;;  %v1087_v52 = vld [vmem:[#allocation6 + $0x28] sm:$0xff] }
 0xb1c   :  { %v852_v55 = vmul.f32 %v850_v39, %v789_v38 }
 0xb1d   :  { %v853_v54 = vmul.f32 %v851_v47, %v850_v39  ;;  %v2407_v39 = vpack.c.bf16 %v1105_v53, %v1103_v31 }
 0xb1f   :  { %855 = vrot.lane.b32.xlu0 %v853_v54, %s2878_s4  ;;  %v1104_v54 = vld [vmem:[#allocation7 + $0x30] sm:$0xff] }
 0xb91   :  { %v856_v56 = vpop.permute.xlu0 %855 }
 0xb92   :  { %v858_v57 = vadd.f32 %v856_v56, %v852_v55  ;;  %v1107_v55 = vld [vmem:[#allocation7 + $0x48] sm:$0xff]  ;;  %v1109_v56 = vld [vmem:[#allocation7 + $0x58] sm:$0xff] }
 0xb94   :  { %2567 = vtanh.f32 %v858_v57 }
 0xb9e   :  { %v2568_v58 = vpop.eup %2567 }
 0xb9f   :  { %v3351_v59 = vmul.f32 %v2568_v58, %v851_v47  ;;  %v1102_v47 = vld [vmem:[#allocation7 + $0x20] sm:$0xff]  ;;  %v2411_v58 = vpack.c.bf16 %v1109_v56, %v1107_v55 }
 0xba1   :  { %v861_v60 = vpack.c.bf16 %v3351_v59, %v3351_v59 }
 0xba3   :  { %863 = vrot.lane.b32.xlu1 %v861_v60, %s2878_s4 }
 0xc15   :  { %v864_v61 = vpop.permute.xlu1 %863 }
 0xc16   :  { %2254 = vmatmul.mubr.msk.bf16.vlgmr.msra.gmra.mrb[12].mxu0 %vm236_vm0, %v864_v61 }
 0xc17   :  { %1184 = vmatprep.mubr.f32.mxu0 %v2875_v0  ;;  %2406 = vmatpush1.bf16.msra.mxu0 %v2405_v37 }
 0xc18   :  { %2408 = vmatprep.subr.bf16.mxu0 %v2407_v39 }
 0xce9   :  { %v906_v62 = vpop.f32.mrb[12].mxu0 }
 0xcea   :  { %v907_v14 = vadd.f32 %v906_v62, %v865_v21  ;;  %v908_v2 = vpop.f32.mrb[13].mxu0  ;;  %v1106_v21 = vld [vmem:[#allocation7 + $0x40] sm:$0xff]  ;;  %v1108_v62 = vld [vmem:[#allocation7 + $0x50] sm:$0xff] }
 0xceb   :  { %v909_v3 = vadd.f32 %v908_v2, %v866_v12  ;;  %v910_v6 = vpop.f32.mrb[14].mxu0  ;;  %v1113_v2 = vld [vmem:[#allocation7 + $0x78] sm:$0xff] }
 0xcec   :  { %2569 = vtanh.f32 %v907_v14  ;;  %v911_v9 = vpop.f32.mrb[15].mxu0  ;;  %v2413_v14 = vpack.c.bf16 %v1108_v62, %v1106_v21  ;;  %v1110_v6 = vld [vmem:[#allocation7 + $0x60] sm:$0xff]  ;;  %v1091_v21 = vld [vmem:[#allocation6 + $0x48] sm:$0xff]  ;;  %v1093_v62 = vld [vmem:[#allocation6 + $0x58] sm:$0xff] }
 0xced   :  { %2571 = vtanh.f32 %v909_v3  ;;  %v1112_v9 = vld [vmem:[#allocation7 + $0x70] sm:$0xff] }
 0xcf6   :  { %v2570_v10 = vpop.eup %2569 }
 0xcf7   :  { %v2572_v11 = vpop.eup %2571  ;;  %v915_v13 = vmul.f32 0.5, %v2570_v10  ;;  %v2417_v10 = vpack.c.bf16 %v1112_v9, %v1110_v6  ;;  %v1092_v6 = vld [vmem:[#allocation6 + $0x50] sm:$0xff] }
 0xcf8   :  { %v916_v16 = vmul.f32 %v2572_v11, %v3246_v26  ;;  %v3382_v11 = vld [vmem:[#allocation9 + $0x4] ss:$8 sps:$4 sm:$0xff]  }
 0xcf9   :  { %v917_v17 = vadd.f32 0.5, %v915_v13  ;;  %v1083_v13 = vld [vmem:[#allocation6 + $0x8] sm:$0xff]  ;;  %1344 = vmatprep.subr.bf16.mxu1 %v3382_v11 }
 0xcfa   :  { %v918_v18 = vadd.f32 %v916_v16, %v3248_v32  ;;  %v1085_v16 = vld [vmem:[#allocation6 + $0x18] sm:$0xff] }
 0xcfb   :  { %v919_v24 = vmul.f32 %v917_v17, %v858_v57  ;;  %v2409_v57 = vpack.c.bf16 %v1104_v54, %v1102_v47 }
 0xcfc   :  { %v920_v20 = vmul.f32 %v918_v18, %v917_v17  ;;  %v2419_v17 = vpack.c.bf16 %v1085_v16, %v1083_v13  ;;  %v1097_v13 = vld [vmem:[#allocation6 + $0x78] sm:$0xff] }
 0xcfd   :  { %2410 = vmatpush1.bf16.msra.mxu0 %v2409_v57  ;;  %v2423_v57 = vpack.c.bf16 %v1089_v27, %v1087_v52 }
 0xcfe   :  { %922 = vrot.lane.b32.xlu0 %v920_v20, %s2878_s4  ;;  %2412 = vmatprep.subr.bf16.mxu0 %v2411_v58  ;;  %v3388_v20 = vld [vmem:[#allocation9 + $0x14] ss:$8 sps:$4 sm:$0xff]   ;;  %v1086_v58 = vld [vmem:[#allocation6 + $0x20] sm:$0xff] }
 0xd01   :  { %2414 = vmatpush1.bf16.msra.mxu0 %v2413_v14 }
 0xd70   :  { %v923_v25 = vpop.permute.xlu0 %922 }
 0xd71   :  { %v925_v28 = vadd.f32 %v923_v25, %v919_v24  ;;  %v3390_v25 = vld [vmem:[#allocation9 + $0x10] ss:$8 sps:$4 sm:$0xff]  }
 0xd73   :  { %2573 = vtanh.f32 %v925_v28 }
 0xd7d   :  { %v2574_v29 = vpop.eup %2573 }
 0xd7e   :  { %v927_v33 = vmul.f32 %v2574_v29, %v918_v18  ;;  %v3384_v18 = vld [vmem:[#allocation9] ss:$8 sps:$4 sm:$0xff]   ;;  %v3395_v29 = vld [vmem:[#allocation9 + $0x24] ss:$8 sps:$4 sm:$0xff]  }
 0xd80   :  { %v928_v34 = vpack.c.bf16 %v927_v33, %v927_v33 }
 0xd82   :  { %930 = vrot.lane.b32.xlu1 %v928_v34, %s2878_s4  ;;  %v3403_v34 = vld [vmem:[#allocation9 + $0x34] ss:$8 sps:$4 sm:$0xff]  }
 0xd86   :  { %1005 = vrot.lane.b32.xlu1 %v3273_v7, %s2878_s4 }
 0xd8a   :  { %1014 = vrot.lane.b32.xlu1 %v3293_v45, %s2878_s4 }
 0xd8e   :  { %996 = vrot.lane.b32.xlu1 %v3253_v44, %s2878_s4 }
 0xd92   :  { %1023 = vrot.lane.b32.xlu1 %v3313_v4, %s2878_s4 }
 0xdf4   :  { %v931_v35 = vpop.permute.xlu1 %930 }
 0xdf5   :  { %2255 = vmatmul.mubr.msk.bf16.vlgmr.msra.gmra.mrb[16].mxu1 %vm236_vm0, %v931_v35  ;;  %v3405_v35 = vld [vmem:[#allocation9 + $0x30] ss:$8 sps:$4 sm:$0xff]  }
 0xdf6   :  { %1376 = vmatprep.mubr.bf16.mxu1 %v2876_v1  ;;  %1345 = vmatpush1.bf16.msra.mxu1 %v3384_v18 }
 0xdf7   :  { %1346 = vmatprep.subr.bf16.mxu1 %v3388_v20 }
 0xdfa   :  { %1347 = vmatpush1.bf16.msra.mxu1 %v3390_v25 }
 0xdfb   :  { %1348 = vmatprep.subr.bf16.mxu1 %v3395_v29 }
 0xec8   :  { %v973_v38 = vpop.f32.mrb[16].mxu1 }
 0xec9   :  { %v974_v7 = vadd.f32 %v973_v38, %v932_v36  ;;  %v975_v42 = vpop.f32.mrb[17].mxu1 }
 0xeca   :  { %v976_v43 = vadd.f32 %v975_v42, %v933_v40  ;;  %v977_v45 = vpop.f32.mrb[18].mxu1 }
 0xecb   :  { %2575 = vtanh.f32 %v974_v7  ;;  %v978_v46 = vpop.f32.mrb[19].mxu1 }
 0xecc   :  { %2577 = vtanh.f32 %v976_v43 }
 0xed5   :  { %v2576_v44 = vpop.eup %2575 }
 0xed6   :  { %v2578_v48 = vpop.eup %2577  ;;  %v982_v4 = vmul.f32 0.5, %v2576_v44 }
 0xed7   :  { %v983_v49 = vmul.f32 %v2578_v48, %v3246_v26 }
 0xed8   :  { %v984_v22 = vadd.f32 0.5, %v982_v4  ;;  %v1082_v4 = vld [vmem:[#allocation6] sm:$0xff] }
 0xed9   :  { %v985_v50 = vadd.f32 %v983_v49, %v3248_v32  ;;  %v1084_v49 = vld [vmem:[#allocation6 + $0x10] sm:$0xff] }
 0xeda   :  { %v986_v60 = vmul.f32 %v984_v22, %v925_v28  ;;  %v2421_v47 = vpack.c.bf16 %v1084_v49, %v1082_v4 }
 0xedb   :  { %v987_v51 = vmul.f32 %v985_v50, %v984_v22 }
 0xedd   :  { %989 = vrot.lane.b32.xlu0 %v987_v51, %s2878_s4 }
 0xee1   :  { %1009 = vrot.lane.b32.xlu0 %v927_v33, %s2878_s4  ;;  %v3397_v33 = vld [vmem:[#allocation9 + $0x20] ss:$8 sps:$4 sm:$0xff]  }
 0xee2   :  { %1349 = vmatpush1.bf16.msra.mxu1 %v3397_v33 }
 0xee3   :  { %1350 = vmatprep.subr.bf16.mxu1 %v3403_v34 }
 0xee5   :  { %1018 = vrot.lane.b32.xlu0 %v3351_v59, %s2878_s4  ;;  %v1111_v59 = vld [vmem:[#allocation7 + $0x68] sm:$0xff] }
 0xee6   :  { %v2415_v3 = vpack.c.bf16 %v1113_v2, %v1111_v59  ;;  %1351 = vmatpush1.bf16.msra.mxu1 %v3405_v35  ;;  %v2427_v2 = vpack.c.bf16 %v1093_v62, %v1091_v21 }
 0xee7   :  { %1413 = vmatprep.subr.bf16.mxu1 %v3382_v11 }
 0xee8   :  { %2416 = vmatprep.subr.bf16.mxu0 %v2415_v3  ;;  %v1090_v3 = vld [vmem:[#allocation6 + $0x40] sm:$0xff] }
 0xee9   :  { %2418 = vmatpush1.bf16.msra.mxu0 %v2417_v10  ;;  %1377 = vmatmul.mubr.bf16.vlgmr.msra.gmra.mrb[20].mxu1 %v2876_v1  ;;  %v1095_v10 = vld [vmem:[#allocation6 + $0x68] sm:$0xff]  ;;  %v2429_v16 = vpack.c.bf16 %v1092_v6, %v1090_v3 }
 0xeea   :  { %2420 = vmatprep.subr.bf16.mxu0 %v2419_v17  ;;  %1414 = vmatpush1.bf16.msra.mxu1 %v3384_v18  ;;  %v2431_v17 = vpack.c.bf16 %v1097_v13, %v1095_v10 }
 0xeeb   :  { %1445 = vmatprep.mubr.bf16.mxu1 %v2876_v1  ;;  %1415 = vmatprep.subr.bf16.mxu1 %v3388_v20 }
 0xeee   :  { %1416 = vmatpush1.bf16.msra.mxu1 %v3390_v25 }
 0xeef   :  { %1417 = vmatprep.subr.bf16.mxu1 %v3395_v29 }
 0xef2   :  { %1418 = vmatpush1.bf16.msra.mxu1 %v3397_v33 }
 0xef3   :  { %1419 = vmatprep.subr.bf16.mxu1 %v3403_v34 }
 0xef6   :  { %1420 = vmatpush1.bf16.msra.mxu1 %v3405_v35 }
 0xef7   :  { %1547 = vmatprep.subr.bf16.mxu1 %v3382_v11 }
 0xf4f   :  { %v990_v61 = vpop.permute.xlu0 %989 }
 0xf50   :  { %v992_v12 = vadd.f32 %v990_v61, %v986_v60  ;;  %v1088_v60 = vld [vmem:[#allocation6 + $0x30] sm:$0xff] }
 0xf51   :  { %v2425_v59 = vpack.c.bf16 %v1088_v60, %v1086_v58 }
 0xf52   :  { %2579 = vtanh.f32 %v992_v12 }
 0xf53   :  { %v1010_v36 = vpop.permute.xlu0 %1009 }
 0xf57   :  { %v1019_v40 = vpop.permute.xlu0 %1018 }
 0xf5c   :  { %v2580_v24 = vpop.eup %2579 }
 0xf5d   :  { %v994_v28 = vmul.f32 %v2580_v24, %v985_v50  ;;  %v1094_v24 = vld [vmem:[#allocation6 + $0x60] sm:$0xff] }
 0xf5f   :  { %1000 = vrot.lane.b32.xlu0 %v994_v28, %s2878_s4  ;;  %v1096_v28 = vld [vmem:[#allocation6 + $0x70] sm:$0xff] }
 0xf63   :  { %1027 = vrot.lane.b32.xlu0 %v3332_v41, %s2878_s4  ;;  %v1006_v41 = vpop.permute.xlu1 %1005 }
 0xf64   :  { %v3423_v42 = vsel %vm199_vm2, %v1010_v36, %v1006_v41  ;;  %v1012_v50 = vsel %vm199_vm2, %v1006_v41, %v1010_v36  ;;  %v2433_v36 = vpack.c.bf16 %v1096_v28, %v1094_v24 }
 0xf65   :  { %v1062_v44 = vrot.slane %v3423_v42, 6  ;;  %v1071_v54 = vrot.slane %v1012_v50, 4  ;;  %v1036_v41 = vrot.slane %v1012_v50, 6  ;;  %v1048_v4 = vrot.slane %v3423_v42, 4 }
 0xf67   :  { %v1015_v38 = vpop.permute.xlu1 %1014 }
 0xf68   :  { %v3427_v45 = vsel %vm199_vm2, %v1015_v38, %v1019_v40  ;;  %v1032_v48 = vsel %vm199_vm2, %v1019_v40, %v1015_v38 }
 0xf69   :  { %v1069_v51 = vrot.slane %v3427_v45, 6  ;;  %v1064_v30 = vrot.slane %v1032_v48, 4  ;;  %v1045_v38 = vrot.slane %v1032_v48, 6 }
 0xf6b   :  { %v997_v7 = vpop.permute.xlu1 %996 }
 0xf6f   :  { %v1024_v22 = vpop.permute.xlu1 %1023 }
 0xfd1   :  { %v1001_v43 = vpop.permute.xlu0 %1000 }
 0xfd2   :  { %v3431_v46 = vsel %vm199_vm2, %v1001_v43, %v997_v7  ;;  %v1003_v55 = vsel %vm199_vm2, %v997_v7, %v1001_v43  ;;  %v1039_v43 = vrot.slane %v3427_v45, 4 }
 0xfd3   :  { %v1076_v19 = vsel %vm1053_vm3, %v3431_v46, %v1062_v44  ;;  %v1074_v14 = vrot.slane %v1003_v55, 2  ;;  %v1054_v40 = vsel %vm1053_vm3, %v1003_v55, %v1036_v41  ;;  %v1051_v50 = vrot.slane %v3431_v46, 2 }
 0xfd4   :  { %v1077_v56 = vsel %vm1055_vm4, %v1076_v19, %v1064_v30  ;;  %v1056_v49 = vsel %vm1055_vm4, %v1054_v40, %v1039_v43  ;;  %v1280_v19 = vld [vmem:[%s3689_s8] sm:$0x3] }
 0xfd5   :  { %v1028_v23 = vpop.permute.xlu0 %1027  ;;  %v1289_v52 = vrot.slane %v1280_v19, %v411_v8 }
 0xfd6   :  { %v1030_v31 = vsel %vm199_vm2, %v1024_v22, %v1028_v23  ;;  %v1031_v53 = vsel %vm199_vm2, %v1028_v23, %v1024_v22  ;;  %v1285_v23 = vrot.slane %v1280_v19, %v407_v5 }
 0xfd7   :  { %v1067_v37 = vrot.slane %v1031_v53, 2  ;;  %v1079_v39 = vsel %vm1053_vm3, %v1030_v31, %v1069_v51  ;;  %v1042_v7 = vrot.slane %v1030_v31, 2  ;;  %v1059_v44 = vsel %vm1053_vm3, %v1031_v53, %v1045_v38 }
 0xfd8   :  { %v1080_v12 = vsel %vm1055_vm4, %v1079_v39, %v1071_v54  ;;  %v1060_v48 = vsel %vm1055_vm4, %v1059_v44, %v1048_v4 }
 0xfd9   :  { %v1078_v61 = vsel %vm1057_vm5, %v1077_v56, %v1067_v37  ;;  %v1081_v9 = vsel %vm1057_vm5, %v1080_v12, %v1074_v14  ;;  %v3463_v22 = vsel %vm1057_vm5, %v1056_v49, %v1042_v7  ;;  %v3473_v42 = vsel %vm1057_vm5, %v1060_v48, %v1051_v50 }
 0xfda   :  { %2256 = vmatmul.mubr.msk.f32.vlgmr.msra.gmra.mrb[16].mxu0 %vm236_vm0, %v1078_v61 }
 0xfdb   :  { %2422 = vmatpush1.bf16.msra.mxu0 %v2421_v47  ;;  %1190 = vmatprep.mubr.f32.mxu0 %v2875_v0 }
 0xfdc   :  { %2424 = vmatprep.subr.bf16.mxu0 %v2423_v57 }
 0xfde   :  { %2257 = vmatmul.mubr.msk.f32.gmra.mrb[18].mxu0 %vm236_vm0, %v1081_v9 }
 0xfdf   :  { %2426 = vmatpush1.bf16.msra.mxu0 %v2425_v59  ;;  %1267 = vmatprep.mubr.f32.mxu0 %v2875_v0 }
 0xfe0   :  { %2428 = vmatprep.subr.bf16.mxu0 %v2427_v2 }
 0xfe3   :  { %2430 = vmatpush1.bf16.msra.mxu0 %v2429_v16 }
 0xfe4   :  { %2432 = vmatprep.subr.bf16.mxu0 %v2431_v17 }
 0xfe7   :  { %2434 = vmatpush1.bf16.msra.mxu0 %v2433_v36 }
 0xfe8   :  { %1480 = vmatprep.subr.bf16.mxu0 %v3382_v11 }
 0xfea   :  { %2258 = vmatmul.mubr.msk.f32.vlgmr.msra.gmra.mrb[16].mxu0 %vm236_vm0, %v3463_v22 }
 0xfeb   :  { %1273 = vmatprep.mubr.f32.mxu0 %v2875_v0  ;;  %1481 = vmatpush1.bf16.msra.mxu0 %v3384_v18  ;;  %v1378_v0 = vpop.f32.mrb[20].mxu1 }
 0xfec   :  { %1482 = vmatprep.subr.bf16.mxu0 %v3388_v20  ;;  %v1380_v45 = vpop.f32.mrb[21].mxu1 }
 0xfed   :  { %v1382_v46 = vpop.f32.mrb[22].mxu1 }
 0xfee   :  { %2259 = vmatmul.mubr.msk.f32.gmra.mrb[18].mxu0 %vm236_vm0, %v3473_v42  ;;  %v1383_v51 = vpop.f32.mrb[23].mxu1 }
 0xfef   :  { %1483 = vmatpush1.bf16.msra.mxu0 %v3390_v25  ;;  %1512 = vmatprep.mubr.bf16.mxu0 %v2876_v1 }
 0xff0   :  { %1484 = vmatprep.subr.bf16.mxu0 %v3395_v29 }
 0xff3   :  { %1485 = vmatpush1.bf16.msra.mxu0 %v3397_v33 }
 0xff4   :  { %1486 = vmatprep.subr.bf16.mxu0 %v3403_v34 }
 0xff7   :  { %1487 = vmatpush1.bf16.msra.mxu0 %v3405_v35 }
 0xff8   :  { %1610 = vmatprep.subr.bf16.mxu0 %v3382_v11 }
0x10bd   :  { %v1269_v27 = vpop.f32.mrb[16].mxu0 }
0x10be   :  { %v3491_v30 = vadd.f32 %v1285_v23, %v1269_v27  ;;  %v1271_v31 = vpop.f32.mrb[17].mxu0 }
0x10bf   :  { %v3493_v53 = vadd.f32 %v1289_v52, %v1271_v31 }
0x10c0   :  { %v1379_v37 = vadd.f32 %v1378_v0, %v3491_v30  ;;  %v1406_v6 = vrot.slane %v3491_v30, 2  ;;  %v1473_v51 = vrot.slane %v3491_v30, 4 }
0x10c1   :  { %v1381_v39 = vadd.f32 %v1380_v45, %v3493_v53  ;;  %v1275_v47 = vpop.f32.mrb[18].mxu0  ;;  %v1407_v10 = vrot.slane %v3493_v53, 2 }
0x10c2   :  { %2581 = vtanh.f32 %v1379_v37  ;;  %v3497_v54 = vadd.f32 %v1285_v23, %v1275_v47  ;;  %v1277_v55 = vpop.f32.mrb[19].mxu0  ;;  %v1474_v23 = vrot.slane %v3493_v53, 4 }
0x10c3   :  { %2583 = vtanh.f32 %v1381_v39  ;;  %v3499_v5 = vadd.f32 %v1289_v52, %v1277_v55 }
0x10cc   :  { %v2582_v63 = vpop.eup %2581 }
0x10cd   :  { %v2584_v8 = vpop.eup %2583  ;;  %v1387_v56 = vmul.f32 0.5, %v2582_v63 }
0x10ce   :  { %v1388_v57 = vmul.f32 %v2584_v8, %v3246_v26 }
0x10cf   :  { %v1389_v58 = vadd.f32 0.5, %v1387_v56 }
0x10d0   :  { %v1390_v60 = vadd.f32 %v1388_v57, %v3248_v32 }
0x10d1   :  { %v1391_v21 = vmul.f32 0.0, %v1389_v58 }
0x10d2   :  { %v1392_v61 = vmul.f32 %v1390_v60, %v1389_v58 }
0x10d4   :  { %1394 = vrot.lane.b32.xlu1 %v1392_v61, %s2878_s4 }
0x1146   :  { %v1395_v62 = vpop.permute.xlu1 %1394 }
0x1147   :  { %v1397_v12 = vadd.f32 %v1395_v62, %v1391_v21 }
0x1149   :  { %2585 = vtanh.f32 %v1397_v12 }
0x1153   :  { %v2586_v14 = vpop.eup %2585 }
0x1154   :  { %v3504_v59 = vmul.f32 %v2586_v14, %v1390_v60 }
0x1156   :  { %v1400_v2 = vpack.c.bf16 %v3504_v59, %v3504_v59 }
0x1158   :  { %1402 = vrot.lane.b32.xlu0 %v1400_v2, %s2878_s4 }
0x11ca   :  { %v1403_v3 = vpop.permute.xlu0 %1402 }
0x11cb   :  { %2268 = vmatmul.mubr.msk.bf16.vlgmr.msra.gmra.mrb[24].mxu1 %vm236_vm0, %v1403_v3  ;;  %v1540_v3 = vrot.slane %v3491_v30, 6 }
0x11cc   :  { %1548 = vmatpush1.bf16.msra.mxu1 %v3384_v18  ;;  %1579 = vmatprep.mubr.bf16.mxu1 %v2876_v1 }
0x11cd   :  { %1549 = vmatprep.subr.bf16.mxu1 %v3388_v20 }
0x11d0   :  { %1550 = vmatpush1.bf16.msra.mxu1 %v3390_v25 }
0x11d1   :  { %1551 = vmatprep.subr.bf16.mxu1 %v3395_v29 }
0x11d4   :  { %1552 = vmatpush1.bf16.msra.mxu1 %v3397_v33 }
0x11d5   :  { %1553 = vmatprep.subr.bf16.mxu1 %v3403_v34 }
0x11d8   :  { %1554 = vmatpush1.bf16.msra.mxu1 %v3405_v35 }
0x11d9   :  { %1679 = vmatprep.subr.bf16.mxu1 %v3382_v11 }
0x129e   :  { %v1447_v9 = vpop.f32.mrb[24].mxu1 }
0x129f   :  { %v1448_v13 = vadd.f32 %v1447_v9, %v1406_v6  ;;  %v1449_v16 = vpop.f32.mrb[25].mxu1  ;;  %v1541_v9 = vrot.slane %v3493_v53, 6 }
0x12a0   :  { %v1450_v17 = vadd.f32 %v1449_v16, %v1407_v10  ;;  %v1451_v24 = vpop.f32.mrb[26].mxu1 }
0x12a1   :  { %2587 = vtanh.f32 %v1448_v13  ;;  %v1452_v28 = vpop.f32.mrb[27].mxu1 }
0x12a2   :  { %2589 = vtanh.f32 %v1450_v17 }
0x12ab   :  { %v2588_v41 = vpop.eup %2587 }
0x12ac   :  { %v2590_v36 = vpop.eup %2589  ;;  %v1456_v38 = vmul.f32 0.5, %v2588_v41 }
0x12ad   :  { %v1457_v40 = vmul.f32 %v2590_v36, %v3246_v26 }
0x12ae   :  { %v1458_v7 = vadd.f32 0.5, %v1456_v38 }
0x12af   :  { %v1459_v43 = vadd.f32 %v1457_v40, %v3248_v32 }
0x12b0   :  { %v1460_v4 = vmul.f32 %v1458_v7, %v1397_v12 }
0x12b1   :  { %v1461_v44 = vmul.f32 %v1459_v43, %v1458_v7 }
0x12b3   :  { %1463 = vrot.lane.b32.xlu1 %v1461_v44, %s2878_s4 }
0x1325   :  { %v1464_v49 = vpop.permute.xlu1 %1463 }
0x1326   :  { %v1466_v48 = vadd.f32 %v1464_v49, %v1460_v4 }
0x1328   :  { %2591 = vtanh.f32 %v1466_v48 }
0x1332   :  { %v2592_v50 = vpop.eup %2591 }
0x1333   :  { %v3524_v0 = vmul.f32 %v2592_v50, %v1459_v43 }
0x1335   :  { %v1469_v45 = vpack.c.bf16 %v3524_v0, %v3524_v0 }
0x1337   :  { %1471 = vrot.lane.b32.xlu0 %v1469_v45, %s2878_s4 }
0x13a9   :  { %v1472_v46 = vpop.permute.xlu0 %1471 }
0x13aa   :  { %2269 = vmatmul.mubr.msk.bf16.vlgmr.msra.gmra.mrb[20].mxu0 %vm236_vm0, %v1472_v46 }
0x13ab   :  { %1611 = vmatpush1.bf16.msra.mxu0 %v3384_v18  ;;  %1642 = vmatprep.mubr.bf16.mxu0 %v2876_v1 }
0x13ac   :  { %1612 = vmatprep.subr.bf16.mxu0 %v3388_v20 }
0x13af   :  { %1613 = vmatpush1.bf16.msra.mxu0 %v3390_v25 }
0x13b0   :  { %1614 = vmatprep.subr.bf16.mxu0 %v3395_v29 }
0x13b3   :  { %1615 = vmatpush1.bf16.msra.mxu0 %v3397_v33 }
0x13b4   :  { %1616 = vmatprep.subr.bf16.mxu0 %v3403_v34 }
0x13b7   :  { %1617 = vmatpush1.bf16.msra.mxu0 %v3405_v35 }
0x13b8   :  { %1746 = vmatprep.subr.bf16.mxu0 %v3382_v11 }
0x147d   :  { %v1514_v19 = vpop.f32.mrb[20].mxu0 }
0x147e   :  { %v1515_v52 = vadd.f32 %v1514_v19, %v1473_v51  ;;  %v1516_v27 = vpop.f32.mrb[21].mxu0 }
0x147f   :  { %v1517_v31 = vadd.f32 %v1516_v27, %v1474_v23  ;;  %v1518_v37 = vpop.f32.mrb[22].mxu0 }
0x1480   :  { %2593 = vtanh.f32 %v1515_v52  ;;  %v1519_v39 = vpop.f32.mrb[23].mxu0 }
0x1481   :  { %2595 = vtanh.f32 %v1517_v31 }
0x148a   :  { %v2594_v47 = vpop.eup %2593 }
0x148b   :  { %v2596_v55 = vpop.eup %2595  ;;  %v1523_v63 = vmul.f32 0.5, %v2594_v47 }
0x148c   :  { %v1524_v8 = vmul.f32 %v2596_v55, %v3246_v26 }
0x148d   :  { %v1525_v56 = vadd.f32 0.5, %v1523_v63 }
0x148e   :  { %v1526_v57 = vadd.f32 %v1524_v8, %v3248_v32 }
0x148f   :  { %v1527_v60 = vmul.f32 %v1525_v56, %v1466_v48 }
0x1490   :  { %v1528_v58 = vmul.f32 %v1526_v57, %v1525_v56 }
0x1492   :  { %1530 = vrot.lane.b32.xlu1 %v1528_v58, %s2878_s4 }
0x1504   :  { %v1531_v61 = vpop.permute.xlu1 %1530 }
0x1505   :  { %v1533_v21 = vadd.f32 %v1531_v61, %v1527_v60 }
0x1507   :  { %2597 = vtanh.f32 %v1533_v21 }
0x1511   :  { %v2598_v62 = vpop.eup %2597 }
0x1512   :  { %v3544_v12 = vmul.f32 %v2598_v62, %v1526_v57 }
0x1514   :  { %v1536_v14 = vpack.c.bf16 %v3544_v12, %v3544_v12 }
0x1516   :  { %1538 = vrot.lane.b32.xlu0 %v1536_v14, %s2878_s4  ;;  %v1673_v14 = vrot.slane %v3499_v5, 2 }
0x1588   :  { %v1539_v2 = vpop.permute.xlu0 %1538 }
0x1589   :  { %2270 = vmatmul.mubr.msk.bf16.vlgmr.msra.gmra.mrb[28].mxu1 %vm236_vm0, %v1539_v2 }
0x158a   :  { %1680 = vmatpush1.bf16.msra.mxu1 %v3384_v18  ;;  %1711 = vmatprep.mubr.bf16.mxu1 %v2876_v1 }
0x158b   :  { %1681 = vmatprep.subr.bf16.mxu1 %v3388_v20 }
0x158e   :  { %1682 = vmatpush1.bf16.msra.mxu1 %v3390_v25 }
0x158f   :  { %1683 = vmatprep.subr.bf16.mxu1 %v3395_v29 }
0x1592   :  { %1684 = vmatpush1.bf16.msra.mxu1 %v3397_v33 }
0x1593   :  { %1685 = vmatprep.subr.bf16.mxu1 %v3403_v34 }
0x1596   :  { %1686 = vmatpush1.bf16.msra.mxu1 %v3405_v35 }
0x1597   :  { %1813 = vmatprep.subr.bf16.mxu1 %v3382_v11 }
0x165c   :  { %v1581_v6 = vpop.f32.mrb[28].mxu1 }
0x165d   :  { %v1582_v10 = vadd.f32 %v1581_v6, %v1540_v3  ;;  %v1583_v13 = vpop.f32.mrb[29].mxu1 }
0x165e   :  { %v1584_v16 = vadd.f32 %v1583_v13, %v1541_v9  ;;  %v1585_v17 = vpop.f32.mrb[30].mxu1  ;;  %v1934_v13 = vld [vmem:[#allocation10 + $0x8] sm:$0xff] }
0x165f   :  { %2599 = vtanh.f32 %v1582_v10  ;;  %v1586_v24 = vpop.f32.mrb[31].mxu1  ;;  %v1933_v10 = vld [vmem:[#allocation10] sm:$0xff] }
0x1660   :  { %2601 = vtanh.f32 %v1584_v16  ;;  %v2435_v16 = vpack.c.bf16 %v1934_v13, %v1933_v10 }
0x1669   :  { %v2600_v28 = vpop.eup %2599 }
0x166a   :  { %v2602_v41 = vpop.eup %2601  ;;  %v1590_v36 = vmul.f32 0.5, %v2600_v28 }
0x166b   :  { %v1591_v38 = vmul.f32 %v2602_v41, %v3246_v26 }
0x166c   :  { %v1592_v40 = vadd.f32 0.5, %v1590_v36 }
0x166d   :  { %v1593_v11 = vadd.f32 %v1591_v38, %v3248_v32 }
0x166e   :  { %v1594_v30 = vmul.f32 %v1592_v40, %v1533_v21  ;;  %v1672_v21 = vrot.slane %v3497_v54, 2 }
0x166f   :  { %v1595_v7 = vmul.f32 %v1593_v11, %v1592_v40  ;;  %v1935_v40 = vld [vmem:[#allocation10 + $0x10] sm:$0xff] }
0x1671   :  { %1597 = vrot.lane.b32.xlu1 %v1595_v7, %s2878_s4 }
0x16e3   :  { %v1598_v53 = vpop.permute.xlu1 %1597 }
0x16e4   :  { %v1600_v43 = vadd.f32 %v1598_v53, %v1594_v30  ;;  %v1937_v53 = vld [vmem:[#allocation10 + $0x20] sm:$0xff] }
0x16e6   :  { %2603 = vtanh.f32 %v1600_v43 }
0x16f0   :  { %v2604_v44 = vpop.eup %2603 }
0x16f1   :  { %v3564_v4 = vmul.f32 %v2604_v44, %v1593_v11  ;;  %v1936_v11 = vld [vmem:[#allocation10 + $0x18] sm:$0xff] }
0x16f2   :  { %v2439_v7 = vpack.c.bf16 %v1936_v11, %v1935_v40  ;;  %v2030_v40 = vld [vmem:[#allocation12 + $0x28] sm:$0xff] }
0x16f3   :  { %v1603_v49 = vpack.c.bf16 %v3564_v4, %v3564_v4 }
0x16f5   :  { %1605 = vrot.lane.b32.xlu0 %v1603_v49, %s2878_s4  ;;  %v1939_v49 = vld [vmem:[#allocation10 + $0x30] sm:$0xff] }
0x1767   :  { %v1606_v48 = vpop.permute.xlu0 %1605 }
0x1768   :  { %2271 = vmatmul.mubr.msk.bf16.vlgmr.msra.gmra.mrb[24].mxu0 %vm236_vm0, %v1606_v48  ;;  %v1940_v48 = vld [vmem:[#allocation10 + $0x38] sm:$0xff] }
0x1769   :  { %1747 = vmatpush1.bf16.msra.mxu0 %v3384_v18  ;;  %1778 = vmatprep.mubr.bf16.mxu0 %v2876_v1 }
0x176a   :  { %1748 = vmatprep.subr.bf16.mxu0 %v3388_v20 }
0x176d   :  { %1749 = vmatpush1.bf16.msra.mxu0 %v3390_v25 }
0x176e   :  { %1750 = vmatprep.subr.bf16.mxu0 %v3395_v29 }
0x1771   :  { %1751 = vmatpush1.bf16.msra.mxu0 %v3397_v33 }
0x1772   :  { %1752 = vmatprep.subr.bf16.mxu0 %v3403_v34 }
0x1775   :  { %1753 = vmatpush1.bf16.msra.mxu0 %v3405_v35 }
0x1776   :  { %2436 = vmatprep.subr.bf16.mxu0 %v2435_v16 }
0x183b   :  { %v1644_v50 = vpop.f32.mrb[24].mxu0 }
0x183c   :  { %v1645_v45 = vadd.f32 %v1644_v50, %v3497_v54  ;;  %v1646_v46 = vpop.f32.mrb[25].mxu0  ;;  %v2447_v50 = vpack.c.bf16 %v1940_v48, %v1939_v49 }
0x183d   :  { %v1647_v51 = vadd.f32 %v1646_v46, %v3499_v5  ;;  %v1648_v19 = vpop.f32.mrb[26].mxu0 }
0x183e   :  { %2605 = vtanh.f32 %v1645_v45  ;;  %v1649_v23 = vpop.f32.mrb[27].mxu0  ;;  %v1739_v45 = vrot.slane %v3497_v54, 4 }
0x183f   :  { %2607 = vtanh.f32 %v1647_v51  ;;  %v1740_v51 = vrot.slane %v3499_v5, 4 }
0x1848   :  { %v2606_v52 = vpop.eup %2605 }
0x1849   :  { %v2608_v27 = vpop.eup %2607  ;;  %v1653_v31 = vmul.f32 0.5, %v2606_v52 }
0x184a   :  { %v1654_v37 = vmul.f32 %v2608_v27, %v3246_v26 }
0x184b   :  { %v1655_v39 = vadd.f32 0.5, %v1653_v31 }
0x184c   :  { %v1656_v47 = vadd.f32 %v1654_v37, %v3248_v32 }
0x184d   :  { %v1657_v63 = vmul.f32 %v1655_v39, %v1600_v43  ;;  %v1938_v43 = vld [vmem:[#allocation10 + $0x28] sm:$0xff] }
0x184e   :  { %v1658_v55 = vmul.f32 %v1656_v47, %v1655_v39  ;;  %v2443_v44 = vpack.c.bf16 %v1938_v43, %v1937_v53  ;;  %v2130_v43 = vld [vmem:[#allocation15 + $0x8] sm:$0xff] }
0x1850   :  { %1660 = vrot.lane.b32.xlu1 %v1658_v55, %s2878_s4 }
0x18c2   :  { %v1661_v8 = vpop.permute.xlu1 %1660 }
0x18c3   :  { %v1663_v56 = vadd.f32 %v1661_v8, %v1657_v63 }
0x18c5   :  { %2609 = vtanh.f32 %v1663_v56 }
0x18cf   :  { %v2610_v57 = vpop.eup %2609 }
0x18d0   :  { %v3583_v58 = vmul.f32 %v2610_v57, %v1656_v47 }
0x18d2   :  { %v1666_v60 = vpack.c.bf16 %v3583_v58, %v3583_v58 }
0x18d4   :  { %1668 = vrot.lane.b32.xlu0 %v1666_v60, %s2878_s4 }
0x1946   :  { %v1669_v61 = vpop.permute.xlu0 %1668 }
0x1947   :  { %2272 = vmatmul.mubr.msk.bf16.vlgmr.msra.gmra.mrb[32].mxu1 %vm236_vm0, %v1669_v61 }
0x1948   :  { %1814 = vmatpush1.bf16.msra.mxu1 %v3384_v18  ;;  %1845 = vmatprep.mubr.bf16.mxu1 %v2876_v1 }
0x1949   :  { %1815 = vmatprep.subr.bf16.mxu1 %v3388_v20 }
0x194c   :  { %1816 = vmatpush1.bf16.msra.mxu1 %v3390_v25 }
0x194d   :  { %1817 = vmatprep.subr.bf16.mxu1 %v3395_v29 }
0x1950   :  { %1818 = vmatpush1.bf16.msra.mxu1 %v3397_v33 }
0x1951   :  { %1819 = vmatprep.subr.bf16.mxu1 %v3403_v34 }
0x1954   :  { %1820 = vmatpush1.bf16.msra.mxu1 %v3405_v35 }
0x1a1a   :  { %v1713_v62 = vpop.f32.mrb[32].mxu1 }
0x1a1b   :  { %v1714_v18 = vadd.f32 %v1713_v62, %v1672_v21  ;;  %v1715_v2 = vpop.f32.mrb[33].mxu1 }
0x1a1c   :  { %v1716_v1 = vadd.f32 %v1715_v2, %v1673_v14  ;;  %v1717_v3 = vpop.f32.mrb[34].mxu1 }
0x1a1d   :  { %2611 = vtanh.f32 %v1714_v18  ;;  %v1718_v20 = vpop.f32.mrb[35].mxu1  ;;  %v1806_v3 = vrot.slane %v3497_v54, 6  ;;  %v2025_v54 = vld [vmem:[#allocation12] sm:$0xff] }
0x1a1e   :  { %2613 = vtanh.f32 %v1716_v1 }
0x1a27   :  { %v2612_v25 = vpop.eup %2611 }
0x1a28   :  { %v2614_v29 = vpop.eup %2613  ;;  %v1722_v6 = vmul.f32 0.5, %v2612_v25  ;;  %v1807_v25 = vrot.slane %v3499_v5, 6  ;;  %v2026_v5 = vld [vmem:[#allocation12 + $0x8] sm:$0xff] }
0x1a29   :  { %v1723_v33 = vmul.f32 %v2614_v29, %v3246_v26 }
0x1a2a   :  { %v1724_v34 = vadd.f32 0.5, %v1722_v6 }
0x1a2b   :  { %v1725_v35 = vadd.f32 %v1723_v33, %v3248_v32 }
0x1a2c   :  { %v1726_v17 = vmul.f32 %v1724_v34, %v1663_v56 }
0x1a2d   :  { %v1727_v9 = vmul.f32 %v1725_v35, %v1724_v34 }
0x1a2f   :  { %1729 = vrot.lane.b32.xlu1 %v1727_v9, %s2878_s4 }
0x1aa1   :  { %v1730_v24 = vpop.permute.xlu1 %1729 }
0x1aa2   :  { %v1732_v28 = vadd.f32 %v1730_v24, %v1726_v17  ;;  %v2451_v17 = vpack.c.bf16 %v2026_v5, %v2025_v54  ;;  %v2028_v24 = vld [vmem:[#allocation12 + $0x18] sm:$0xff] }
0x1aa3   :  { %v2135_v5 = vld [vmem:[#allocation15 + $0x30] sm:$0xff] }
0x1aa4   :  { %2615 = vtanh.f32 %v1732_v28  ;;  %2452 = vmatprep.subr.bf16.mxu1 %v2451_v17 }
0x1aae   :  { %v2616_v41 = vpop.eup %2615 }
0x1aaf   :  { %v3602_v36 = vmul.f32 %v2616_v41, %v1725_v35 }
0x1ab1   :  { %v1735_v38 = vpack.c.bf16 %v3602_v36, %v3602_v36 }
0x1ab3   :  { %1737 = vrot.lane.b32.xlu0 %v1735_v38, %s2878_s4  ;;  %v2029_v38 = vld [vmem:[#allocation12 + $0x20] sm:$0xff] }
0x1ab4   :  { %v2459_v11 = vpack.c.bf16 %v2030_v40, %v2029_v38 }
0x1b25   :  { %v1738_v30 = vpop.permute.xlu0 %1737 }
0x1b26   :  { %2273 = vmatmul.mubr.msk.bf16.vlgmr.msra.gmra.mrb[28].mxu0 %vm236_vm0, %v1738_v30  ;;  %v2032_v30 = vld [vmem:[#allocation12 + $0x38] sm:$0xff] }
0x1b27   :  { %2438 = vmatpush3.bf16.msra.mxu0 %v2435_v16  ;;  %2330 = vmatprep.mubr.msk.f32.mxu0 %vm236_vm0, %v3463_v22  ;;  %v2027_v16 = vld [vmem:[#allocation12 + $0x10] sm:$0xff] }
0x1b28   :  { %2440 = vmatprep.subr.bf16.mxu0 %v2439_v7 }
0x1b2b   :  { %2442 = vmatpush3.bf16.msra.mxu0 %v2439_v7  ;;  %v2031_v7 = vld [vmem:[#allocation12 + $0x30] sm:$0xff] }
0x1b2c   :  { %2444 = vmatprep.subr.bf16.mxu0 %v2443_v44  ;;  %v2463_v53 = vpack.c.bf16 %v2032_v30, %v2031_v7 }
0x1b2f   :  { %2446 = vmatpush3.bf16.msra.mxu0 %v2443_v44  ;;  %v2131_v44 = vld [vmem:[#allocation15 + $0x10] sm:$0xff] }
0x1b30   :  { %2448 = vmatprep.subr.bf16.mxu0 %v2447_v50 }
0x1b33   :  { %2450 = vmatpush3.bf16.msra.mxu0 %v2447_v50  ;;  %v2132_v50 = vld [vmem:[#allocation15 + $0x18] sm:$0xff] }
0x1b36   :  { %2331 = vmatmul.mubr.msk.f32.vlgmr.msra.gmra.mrb[32].mxu0 %vm236_vm0, %v3473_v42 }
0x1bf9   :  { %v1780_v46 = vpop.f32.mrb[28].mxu0 }
0x1bfa   :  { %v1781_v19 = vadd.f32 %v1780_v46, %v1739_v45  ;;  %v1782_v23 = vpop.f32.mrb[29].mxu0  ;;  %v2471_v46 = vpack.c.bf16 %v2132_v50, %v2131_v44 }
0x1bfb   :  { %v1783_v52 = vadd.f32 %v1782_v23, %v1740_v51  ;;  %v1784_v27 = vpop.f32.mrb[30].mxu0 }
0x1bfc   :  { %2617 = vtanh.f32 %v1781_v19  ;;  %v1785_v31 = vpop.f32.mrb[31].mxu0 }
0x1bfd   :  { %2619 = vtanh.f32 %v1783_v52 }
0x1c06   :  { %v2618_v37 = vpop.eup %2617 }
0x1c07   :  { %v2620_v39 = vpop.eup %2619  ;;  %v1789_v47 = vmul.f32 0.5, %v2618_v37 }
0x1c08   :  { %v1790_v55 = vmul.f32 %v2620_v39, %v3246_v26  ;;  %v2275_v39 = vld [vmem:[%s3692_s11] ss:$0 sm:$0xff] }
0x1c09   :  { %v1791_v63 = vadd.f32 0.5, %v1789_v47  ;;  %v3615_v8 = vpop.f32.mrb[32].mxu0 }
0x1c0a   :  { %v3617_v56 = vpop.f32.mrb[33].mxu0  ;;  %v1792_v57 = vadd.f32 %v1790_v55, %v3248_v32 }
0x1c0b   :  { %v1793_v61 = vmul.f32 %v1791_v63, %v1732_v28  ;;  %v2455_v28 = vpack.c.bf16 %v2028_v24, %v2027_v16  ;;  %v2136_v16 = vld [vmem:[#allocation15 + $0x38] sm:$0xff] }
0x1c0c   :  { %v1794_v60 = vmul.f32 %v1792_v57, %v1791_v63  ;;  %v2278_v24 = vld [vmem:[#allocation13] ss:$0 sm:$0xff] }
0x1c0e   :  { %1796 = vrot.lane.b32.xlu1 %v1794_v60, %s2878_s4 }
0x1c80   :  { %v1797_v21 = vpop.permute.xlu1 %1796 }
0x1c81   :  { %v1799_v62 = vadd.f32 %v1797_v21, %v1793_v61  ;;  %v2020_v61 = vadd.f32 %v3615_v8, %v2275_v39  ;;  %v2015_v21 = vadd.f32 %v2275_v39, %v3617_v56 }
0x1c83   :  { %2621 = vtanh.f32 %v1799_v62 }
0x1c8d   :  { %v2622_v14 = vpop.eup %2621 }
0x1c8e   :  { %v1801_v18 = vmul.f32 %v2622_v14, %v1792_v57 }
0x1c90   :  { %v1802_v2 = vpack.c.bf16 %v1801_v18, %v1801_v18 }
0x1c92   :  { %1804 = vrot.lane.b32.xlu0 %v1802_v2, %s2878_s4 }
0x1c96   :  { %1879 = vrot.lane.b32.xlu0 %v3524_v0, %s2878_s4 }
0x1c9a   :  { %1888 = vrot.lane.b32.xlu0 %v3544_v12, %s2878_s4 }
0x1c9e   :  { %1870 = vrot.lane.b32.xlu0 %v3504_v59, %s2878_s4 }
0x1ca2   :  { %1897 = vrot.lane.b32.xlu0 %v3564_v4, %s2878_s4 }
0x1d04   :  { %v1805_v1 = vpop.permute.xlu0 %1804 }
0x1d05   :  { %2274 = vmatmul.mubr.msk.bf16.vlgmr.msra.gmra.mrb[36].mxu1 %vm236_vm0, %v1805_v1 }
0x1d06   :  { %2454 = vmatpush3.bf16.msra.mxu1 %v2451_v17  ;;  %v2479_v17 = vpack.c.bf16 %v2136_v16, %v2135_v5 }
0x1d07   :  { %2456 = vmatprep.subr.bf16.mxu1 %v2455_v28 }
0x1d08   :  { %v1880_v51 = vpop.permute.xlu0 %1879 }
0x1d0a   :  { %2458 = vmatpush3.bf16.msra.mxu1 %v2455_v28 }
0x1d0b   :  { %2460 = vmatprep.subr.bf16.mxu1 %v2459_v11 }
0x1d0c   :  { %v1889_v23 = vpop.permute.xlu0 %1888 }
0x1d0e   :  { %2462 = vmatpush3.bf16.msra.mxu1 %v2459_v11  ;;  %v2281_v11 = vld [vmem:[#allocation16] ss:$0 sm:$0xff] }
0x1d0f   :  { %2464 = vmatprep.subr.bf16.mxu1 %v2463_v53 }
0x1d10   :  { %v1871_v27 = vpop.permute.xlu0 %1870 }
0x1d12   :  { %2466 = vmatpush3.bf16.msra.mxu1 %v2463_v53 }
0x1dd8   :  { %v1847_v20 = vpop.f32.mrb[36].mxu1 }
0x1dd9   :  { %v1848_v29 = vadd.f32 %v1847_v20, %v1806_v3  ;;  %v1849_v6 = vpop.f32.mrb[37].mxu1 }
0x1dda   :  { %v1850_v0 = vadd.f32 %v1849_v6, %v1807_v25  ;;  %v1851_v33 = vpop.f32.mrb[38].mxu1 }
0x1ddb   :  { %2623 = vtanh.f32 %v1848_v29  ;;  %v1852_v12 = vpop.f32.mrb[39].mxu1 }
0x1ddc   :  { %2625 = vtanh.f32 %v1850_v0 }
0x1de5   :  { %v2624_v34 = vpop.eup %2623 }
0x1de6   :  { %v2626_v59 = vpop.eup %2625  ;;  %v1856_v35 = vmul.f32 0.5, %v2624_v34  ;;  %v2024_v34 = vmax.f32 %v2020_v61, 0.0 }
0x1de7   :  { %v1857_v4 = vmul.f32 %v2626_v59, %v3246_v26  ;;  %v2023_v59 = vmax.f32 %v2015_v21, 0.0 }
0x1de8   :  { %v1858_v9 = vadd.f32 0.5, %v1856_v35 }
0x1de9   :  { %v1859_v10 = vadd.f32 %v1857_v4, %v3248_v32 }
0x1dea   :  { %v1860_v26 = vmul.f32 %v1858_v9, %v1799_v62  ;;  %v1898_v62 = vpop.permute.xlu0 %1897 }
0x1deb   :  { %v1861_v13 = vmul.f32 %v1859_v10, %v1858_v9 }
0x1ded   :  { %1863 = vrot.lane.b32.xlu1 %v1861_v13, %s2878_s4  ;;  %v2134_v13 = vld [vmem:[#allocation15 + $0x28] sm:$0xff] }
0x1df1   :  { %1883 = vrot.lane.b32.xlu1 %v1801_v18, %s2878_s4 }
0x1df5   :  { %1892 = vrot.lane.b32.xlu1 %v3602_v36, %s2878_s4  ;;  %v2129_v36 = vld [vmem:[#allocation15] sm:$0xff] }
0x1df6   :  { %v2467_v48 = vpack.c.bf16 %v2130_v43, %v2129_v36 }
0x1df8   :  { %2468 = vmatprep.subr.bf16.mxu0 %v2467_v48 }
0x1df9   :  { %2470 = vmatpush3.bf16.msra.mxu0 %v2467_v48 }
0x1dfa   :  { %2472 = vmatprep.subr.bf16.mxu0 %v2471_v46 }
0x1dfd   :  { %2474 = vmatpush3.bf16.msra.mxu0 %v2471_v46 }
0x1e5f   :  { %v1864_v32 = vpop.permute.xlu1 %1863 }
0x1e60   :  { %v1866_v41 = vadd.f32 %v1864_v32, %v1860_v26 }
0x1e62   :  { %2627 = vtanh.f32 %v1866_v41 }
0x1e63   :  { %v1884_v19 = vpop.permute.xlu1 %1883 }
0x1e64   :  { %v1886_v31 = vsel %vm199_vm2, %v1880_v51, %v1884_v19  ;;  %v1907_v55 = vsel %vm199_vm2, %v1884_v19, %v1880_v51 }
0x1e65   :  { %v1910_v63 = vrot.slane %v1886_v31, 6  ;;  %v1922_v1 = vrot.slane %v1907_v55, 4 }
0x1e67   :  { %v1893_v52 = vpop.permute.xlu1 %1892 }
0x1e68   :  { %v1906_v47 = vsel %vm199_vm2, %v1893_v52, %v1889_v23  ;;  %v1895_v57 = vsel %vm199_vm2, %v1889_v23, %v1893_v52 }
0x1e69   :  { %v1919_v14 = vrot.slane %v1906_v47, 6  ;;  %v1913_v3 = vrot.slane %v1895_v57, 4 }
0x1e6c   :  { %v2628_v49 = vpop.eup %2627 }
0x1e6d   :  { %v1868_v45 = vmul.f32 %v2628_v49, %v1859_v10  ;;  %v2133_v10 = vld [vmem:[#allocation15 + $0x20] sm:$0xff] }
0x1e6e   :  { %v2475_v54 = vpack.c.bf16 %v2134_v13, %v2133_v10 }
0x1e6f   :  { %1874 = vrot.lane.b32.xlu1 %v1868_v45, %s2878_s4 }
0x1e70   :  { %2476 = vmatprep.subr.bf16.mxu0 %v2475_v54 }
0x1e71   :  { %2478 = vmatpush3.bf16.msra.mxu0 %v2475_v54 }
0x1e72   :  { %2480 = vmatprep.subr.bf16.mxu0 %v2479_v17 }
0x1e73   :  { %1901 = vrot.lane.b32.xlu1 %v3583_v58, %s2878_s4 }
0x1e75   :  { %2482 = vmatpush3.bf16.msra.mxu0 %v2479_v17 }
0x1ee1   :  { %v1875_v37 = vpop.permute.xlu1 %1874 }
0x1ee2   :  { %v1877_v58 = vsel %vm199_vm2, %v1871_v27, %v1875_v37  ;;  %v1908_v60 = vsel %vm199_vm2, %v1875_v37, %v1871_v27 }
0x1ee3   :  { %v1927_v18 = vsel %vm1053_vm3, %v1877_v58, %v1910_v63  ;;  %v1925_v29 = vrot.slane %v1908_v60, 2 }
0x1ee4   :  { %v1928_v56 = vsel %vm1055_vm4, %v1927_v18, %v1913_v3 }
0x1ee5   :  { %v1902_v2 = vpop.permute.xlu1 %1901 }
0x1ee6   :  { %v1904_v20 = vsel %vm199_vm2, %v1898_v62, %v1902_v2  ;;  %v1905_v25 = vsel %vm199_vm2, %v1902_v2, %v1898_v62 }
0x1ee7   :  { %v1916_v6 = vrot.slane %v1904_v20, 2  ;;  %v1930_v0 = vsel %vm1053_vm3, %v1905_v25, %v1919_v14 }
0x1ee8   :  { %v1931_v8 = vsel %vm1055_vm4, %v1930_v0, %v1922_v1 }
0x1ee9   :  { %v1929_v33 = vsel %vm1057_vm5, %v1928_v56, %v1916_v6  ;;  %v1932_v12 = vsel %vm1057_vm5, %v1931_v8, %v1925_v29 }
0x1eea   :  { %2349 = vmatprep.mubr.msk.f32.mxu1 %vm236_vm0, %v1929_v33  ;;  %v2123_v35 = vadd.f32 %v1929_v33, %v3463_v22  ;;  %v2124_v15 = vadd.f32 %v1932_v12, %v3473_v42 }
0x1eeb   :  { %2350 = vmatmul.mubr.msk.f32.vlgmr.msra.gmra.mrb[40].mxu1 %vm236_vm0, %v1932_v12 }
0x1eec   :  { %v2126_v4 = vadd.f32 %v2124_v15, %v2024_v34  ;;  %v2125_v9 = vadd.f32 %v2123_v35, %v2023_v59 }
0x1fbe   :  { %v2351_v28 = vpop.f32.mrb[40].mxu1 }
0x1fbf   :  { %v2118_v26 = vadd.f32 %v2351_v28, %v2278_v24  ;;  %v2112_v22 = vpop.f32.mrb[41].mxu1 }
0x1fc0   :  { %v2113_v32 = vadd.f32 %v2278_v24, %v2112_v22 }
0x1fc1   :  { %v2122_v42 = vmax.f32 %v2118_v26, 0.0 }
0x1fc2   :  { %v2121_v41 = vmax.f32 %v2113_v32, 0.0 }
0x1fc3   :  { %v2128_v38 = vadd.f32 %v2126_v4, %v2122_v42 }
0x1fc4   :  { %v2127_v40 = vadd.f32 %v2125_v9, %v2121_v41 }
0x1fc6   :  { %2368 = vmatprep.mubr.msk.f32.mxu0 %vm236_vm0, %v2127_v40 }
0x1fc7   :  { %2369 = vmatmul.mubr.msk.f32.vlgmr.msra.gmra.mrb[34].mxu0 %vm236_vm0, %v2128_v38 }
0x209a   :  { %v2370_v7 = vpop.f32.mrb[34].mxu0 }
0x209b   :  { %v2222_v30 = vadd.f32 %v2370_v7, %v2281_v11  ;;  %v2216_v53 = vpop.f32.mrb[35].mxu0 }
0x209c   :  { %v2217_v36 = vadd.f32 %v2281_v11, %v2216_v53 }
0x209d   :  { %2226 = vst [vmem:[%s3703_s29 + $0x8] sm:$0xff] %v2222_v30 }
0x209e   :  { %2225 = vst [vmem:[%s3703_s29] sm:$0xff] %v2217_v36 }
0x209f   :  { %2231 = vsyncpa [#allocation3], 1 }
0x20a0   :  { %2232 = vsyncpa [#allocation5], 1 }
0x20a1   :  { %2233 = vsyncpa [#allocation8], 1 }
0x20a2   :  { %2234 = vsyncpa [#allocation11], 1 }
0x20a3   :  { %2235 = vsyncpa [#allocation14], 1 }
0x20a4   :  { %2236 = vsyncpa [#allocation17], 1 }

</bundles_post_ra>
